<compile_context>
chip_gen: v7x
topology: tpu7x:2x2x1
jax: 0.10.0
libtpu: 0.0.40
codegen_flags: <defaults>
</compile_context>

<pallas_src>
import jax
import jax.numpy as jnp
from jax.experimental import pallas as pl
from jax.experimental.pallas import tpu as pltpu


def _generator_kernel(z_ref, w1_ref, b1_ref, w2_ref, b2_ref, out_ref):
    # In-kernel cast of the activation tile (VPU, hidden under MXU work).
    z_bf = z_ref[...].astype(jnp.bfloat16)
    # hidden = relu(z @ W1 + b1)        (bf16 inputs, f32 accumulation)
    h = jnp.dot(z_bf, w1_ref[...], preferred_element_type=jnp.float32)
    h = jnp.maximum(h + b1_ref[...], 0.0)          # (1, HIDDEN) broadcasts
    # out = tanh(h @ W2 + b2)           (bf16 inputs, f32 accumulation)
    o = jnp.dot(h.astype(jnp.bfloat16), w2_ref[...],
                preferred_element_type=jnp.float32)
    o = o + b2_ref[...]                            # (1, OUT) broadcasts
    # f32 tanh (works on every generation's EUP), bf16 store (half the HBM
    # writeback bytes and half the vst pushes).
    out_ref[...] = jnp.tanh(o).astype(out_ref.dtype)


def _pick_tm(batch):
    """Row-tile height: multiple of 128 in [128, 512], >= 4 grid steps when
    the batch allows (>= 2 steps per TensorCore under megacore sharding)."""
    tm = (batch // 4) // 128 * 128
    return max(128, min(512, tm))


def base_gan_forward(z, w1_bf16, b1_f32, w2_bf16, b2_f32, out_nchw_shape, *,
                     tm=None):
    """Pallas implementation of BaseGAN.forward(z) == generator(z).

    Expects the weights already persisted in their kernel dtypes:
      w1_bf16/w2_bf16 in bfloat16, b1_f32/b2_f32 in float32 (cast once at
      init, never per call).
    """
    B, latent = z.shape
    hidden = w1_bf16.shape[1]
    out_dim = w2_bf16.shape[1]

    if tm is None:
        tm = _pick_tm(B)
    num_tiles = pl.cdiv(B, tm)
    padded_b = num_tiles * tm
    if padded_b != B:
        # TODO(synk): ragged last batch tile -- pad fallback (the demo shapes
        # divide evenly, so this path is not taken here).
        z = jnp.pad(z, ((0, padded_b - B), (0, 0)))

    # Weights / biases have a constant block index -> keep them VMEM-resident
    # with a single pipeline buffer (no dead double buffer).
    resident = pl.Buffered(1)

    cost = pl.CostEstimate(
        flops=2 * padded_b * (latent * hidden + hidden * out_dim),
        transcendentals=padded_b * out_dim,
        bytes_accessed=(padded_b * latent * 4          # z (f32 in)
                        + latent * hidden * 2          # W1 (bf16)
                        + hidden * 4                   # b1 (f32)
                        + hidden * out_dim * 2         # W2 (bf16)
                        + out_dim * 4                  # b2 (f32)
                        + padded_b * out_dim * 2),     # out (bf16)
    )

    out2d = pl.pallas_call(
        _generator_kernel,
        out_shape=jax.ShapeDtypeStruct((padded_b, out_dim), jnp.bfloat16),
        grid_spec=pl.GridSpec(
            grid=(num_tiles,),
            in_specs=[
                pl.BlockSpec((tm, latent), lambda i: (i, 0)),        # z tile
                pl.BlockSpec((latent, hidden), lambda i: (0, 0),     # W1
                             pipeline_mode=resident),
                pl.BlockSpec((1, hidden), lambda i: (0, 0),          # b1
                             pipeline_mode=resident),
                pl.BlockSpec((hidden, out_dim), lambda i: (0, 0),    # W2
                             pipeline_mode=resident),
                pl.BlockSpec((1, out_dim), lambda i: (0, 0),         # b2
                             pipeline_mode=resident),
            ],
            out_specs=pl.BlockSpec((tm, out_dim), lambda i: (i, 0)),
        ),
        compiler_params=pltpu.CompilerParams(
            dimension_semantics=("parallel",),   # megacore shards batch tiles
        ),
        cost_estimate=cost,
    )(z, w1_bf16, b1_f32, w2_bf16, b2_f32)

    if padded_b != B:
        out2d = out2d[:B]
    return out2d.reshape(out_nchw_shape)


if __name__ == "__main__":
    # Shapes consistent with a GAN generator forward pass; batch sized so the
    # grid has 4 full 128-row MXU tiles (2 per TensorCore on megacore parts).
    B = 512          # batch (4 grid steps of TM=128)
    LATENT = 128     # latent dim (multiple of 128 lanes)
    HIDDEN = 256
    C, H, W = 4, 16, 16
    OUT = C * H * W  # 1024 (lane-dense output tile)

    key = jax.random.PRNGKey(0)
    kz, k1, k2, kb1, kb2 = jax.random.split(key, 5)

    z = jax.random.normal(kz, (B, LATENT), dtype=jnp.float32)

    # Deterministic parameter init (synthetic, not a checkpoint load).
    # Weights are cast to their kernel dtypes ONCE here ("init time") and
    # persisted -- no per-call wrapper casts.
    w1 = (jax.random.normal(k1, (LATENT, HIDDEN), dtype=jnp.float32) * 0.05)
    b1 = (jax.random.normal(kb1, (1, HIDDEN), dtype=jnp.float32) * 0.01)
    w2 = (jax.random.normal(k2, (HIDDEN, OUT), dtype=jnp.float32) * 0.05)
    b2 = (jax.random.normal(kb2, (1, OUT), dtype=jnp.float32) * 0.01)

    w1_bf16 = w1.astype(jnp.bfloat16)
    w2_bf16 = w2.astype(jnp.bfloat16)

    out = base_gan_forward(z, w1_bf16, b1, w2_bf16, b2, (B, C, H, W))
    out = jax.block_until_ready(out)

    # Reference check in plain JAX with the same bf16-input / f32-accumulate
    # math as the kernel (self-consistency check; bf16 casts alone put the
    # kernel ~1e-2 away from the exact f32 PyTorch generator math).
    h_ref = jnp.maximum(
        jnp.dot(z.astype(jnp.bfloat16), w1_bf16,
                preferred_element_type=jnp.float32) + b1, 0.0)
    ref = jnp.tanh(
        jnp.dot(h_ref.astype(jnp.bfloat16), w2_bf16,
                preferred_element_type=jnp.float32) + b2
    ).astype(jnp.bfloat16).reshape(B, C, H, W)

    assert out.shape == (B, C, H, W)
    assert out.dtype == jnp.bfloat16
    assert jnp.allclose(out.astype(jnp.float32), ref.astype(jnp.float32),
                        atol=2e-2, rtol=2e-2)

    print("KERNEL_OK")
</pallas_src>

<mosaic_0001>
module attributes {stable_mosaic.version = 11 : i64} {
  func.func @_generator_kernel(%arg0: i32, %arg1: memref<128x128xf32, #tpu.memory_space<vmem>>, %arg2: memref<128x256xbf16, #tpu.memory_space<vmem>>, %arg3: memref<1x256xf32, #tpu.memory_space<vmem>>, %arg4: memref<256x1024xbf16, #tpu.memory_space<vmem>>, %arg5: memref<1x1024xf32, #tpu.memory_space<vmem>>, %arg6: memref<128x1024xbf16, #tpu.memory_space<vmem>>) attributes {dimension_semantics = [#tpu.dimension_semantics<parallel>], iteration_bounds = array<i64: 4>, scalar_prefetch = 0 : i64, scratch_operands = 0 : i64, tpu.core_type = #tpu.core_type<tc>, window_params = [{transform_indices = @transform_0, window_bounds = array<i64: 128, 128>}, {pipeline_mode = #tpu.pipeline_mode<synchronous>, transform_indices = @transform_1, window_bounds = array<i64: 128, 256>}, {pipeline_mode = #tpu.pipeline_mode<synchronous>, transform_indices = @transform_2, window_bounds = array<i64: 1, 256>}, {pipeline_mode = #tpu.pipeline_mode<synchronous>, transform_indices = @transform_3, window_bounds = array<i64: 256, 1024>}, {pipeline_mode = #tpu.pipeline_mode<synchronous>, transform_indices = @transform_4, window_bounds = array<i64: 1, 1024>}, {transform_indices = @transform_5, window_bounds = array<i64: 128, 1024>}]} {
    %c0 = arith.constant 0 : index
    %c0_0 = arith.constant 0 : index
    %0 = vector.load %arg1[%c0, %c0_0] : memref<128x128xf32, #tpu.memory_space<vmem>>, vector<128x128xf32>
    %1 = arith.truncf %0 : vector<128x128xf32> to vector<128x128xbf16>
    %c0_1 = arith.constant 0 : index
    %c0_2 = arith.constant 0 : index
    %2 = vector.load %arg2[%c0_1, %c0_2] : memref<128x256xbf16, #tpu.memory_space<vmem>>, vector<128x256xbf16>
    %cst = arith.constant dense<0.000000e+00> : vector<128x256xf32>
    %3 = tpu.matmul %1, %2, %cst {dimension_numbers = #tpu.dot_dimension_numbers<[1], [0], [0], [1], [0, 0, 1, 1], [], []>} : vector<128x128xbf16>, vector<128x256xbf16>, vector<128x256xf32> -> vector<128x256xf32>
    %c0_3 = arith.constant 0 : index
    %c0_4 = arith.constant 0 : index
    %4 = vector.load %arg3[%c0_3, %c0_4] : memref<1x256xf32, #tpu.memory_space<vmem>>, vector<1x256xf32>
    %5 = vector.broadcast %4 : vector<1x256xf32> to vector<128x256xf32>
    %6 = arith.addf %3, %5 : vector<128x256xf32>
    %cst_5 = arith.constant 0.000000e+00 : f32
    %7 = vector.broadcast %cst_5 : f32 to vector<128x256xf32>
    %8 = arith.maximumf %6, %7 : vector<128x256xf32>
    %9 = arith.truncf %8 : vector<128x256xf32> to vector<128x256xbf16>
    %c0_6 = arith.constant 0 : index
    %c0_7 = arith.constant 0 : index
    %10 = vector.load %arg4[%c0_6, %c0_7] : memref<256x1024xbf16, #tpu.memory_space<vmem>>, vector<256x1024xbf16>
    %cst_8 = arith.constant dense<0.000000e+00> : vector<128x1024xf32>
    %11 = tpu.matmul %9, %10, %cst_8 {dimension_numbers = #tpu.dot_dimension_numbers<[1], [0], [0], [1], [0, 0, 1, 1], [], []>} : vector<128x256xbf16>, vector<256x1024xbf16>, vector<128x1024xf32> -> vector<128x1024xf32>
    %c0_9 = arith.constant 0 : index
    %c0_10 = arith.constant 0 : index
    %12 = vector.load %arg5[%c0_9, %c0_10] : memref<1x1024xf32, #tpu.memory_space<vmem>>, vector<1x1024xf32>
    %13 = vector.broadcast %12 : vector<1x1024xf32> to vector<128x1024xf32>
    %14 = arith.addf %11, %13 : vector<128x1024xf32>
    %15 = math.tanh %14 : vector<128x1024xf32>
    %16 = arith.truncf %15 : vector<128x1024xf32> to vector<128x1024xbf16>
    %c0_11 = arith.constant 0 : index
    %c0_12 = arith.constant 0 : index
    %17 = vector.load %arg6[%c0_11, %c0_12] : memref<128x1024xbf16, #tpu.memory_space<vmem>>, vector<128x1024xbf16>
    tpu.vector_store %arg6[%c0_11, %c0_12], %16 {strides = array<i32>} : memref<128x1024xbf16, #tpu.memory_space<vmem>>, vector<128x1024xbf16>,
    return
  }
  func.func @transform_0(%arg0: i32) -> (i32, i32) {
    %c0_i32 = arith.constant 0 : i32
    %c0_i32_0 = arith.constant 0 : i32
    return %arg0, %c0_i32 : i32, i32
  }
  func.func @transform_1(%arg0: i32) -> (i32, i32) {
    %c0_i32 = arith.constant 0 : i32
    %c0_i32_0 = arith.constant 0 : i32
    %c0_i32_1 = arith.constant 0 : i32
    return %c0_i32, %c0_i32_0 : i32, i32
  }
  func.func @transform_2(%arg0: i32) -> (i32, i32) {
    %c0_i32 = arith.constant 0 : i32
    %c0_i32_0 = arith.constant 0 : i32
    %c0_i32_1 = arith.constant 0 : i32
    return %c0_i32, %c0_i32_0 : i32, i32
  }
  func.func @transform_3(%arg0: i32) -> (i32, i32) {
    %c0_i32 = arith.constant 0 : i32
    %c0_i32_0 = arith.constant 0 : i32
    %c0_i32_1 = arith.constant 0 : i32
    return %c0_i32, %c0_i32_0 : i32, i32
  }
  func.func @transform_4(%arg0: i32) -> (i32, i32) {
    %c0_i32 = arith.constant 0 : i32
    %c0_i32_0 = arith.constant 0 : i32
    %c0_i32_1 = arith.constant 0 : i32
    return %c0_i32, %c0_i32_0 : i32, i32
  }
  func.func @transform_5(%arg0: i32) -> (i32, i32) {
    %c0_i32 = arith.constant 0 : i32
    %c0_i32_0 = arith.constant 0 : i32
    return %arg0, %c0_i32 : i32, i32
  }
}

</mosaic_0001>

<bundles_post_ra>
// kernel: tpu_custom_call.1
= control target key start
LH: loop header
LB: loop body
LE: loop exit
PB: predicated region body
PF: predicated region fallthrough
CT: control target
= control target key end

     0   :  { %10 = vsyncpa [#allocation3], 0  ;;  %s4151_s0 = inlined_call_operand.hbm [shape: f32[512,128], index: 0, kind: input, shape index: {}]   ;;  %s4152_s1 = inlined_call_operand.hbm [shape: bf16[128,256], index: 1, kind: input, shape index: {}]   ;;  %s4153_s2 = inlined_call_operand.vmem [shape: f32[1,256], index: 2, kind: input, shape index: {}]   ;;  %s4154_s3 = inlined_call_operand.hbm [shape: bf16[256,1024], index: 3, kind: input, shape index: {}]   ;;  %s4155_s4 = inlined_call_operand.vmem [shape: f32[1,1024], index: 4, kind: input, shape index: {}]   ;;  %s4156_s5 = inlined_call_operand.hbm [shape: bf16[512,1024], index: 5, kind: output, shape index: {}]  }
   0x1   :  { %12 = vsyncpa [#allocation3 + $0x1], 0 }
   0x2   :  { %13 = vsyncpa [#allocation6], 0 }
   0x3   :  { %14 = vsyncpa [#allocation4], 0 }
   0x4   :  { %16 = vsyncpa [#allocation4 + $0x1], 0  ;;  %s3392_s18 = smov 0   ;;  %s3394_s19 = smov 0  }
   0x5   :  { %s3396_s20 = smov 0   ;;  %s3398_s21 = smov 0  }
   0x6 LB: > { %s3413_s22 = sadd.s32 4294967295, %s3349_s21   ;;  %s2513_s23 = sadd.s32 4294967294, %s3349_s21   ;;  %s3349_s21 = sphi %s3398_s21, %s4196_s21   ;;  %s3345_s20 = sphi %s3396_s20, %s4195_s20   ;;  %s3341_s19 = sphi %s3394_s19, %s4194_s19   ;;  %s3337_s18 = sphi %s3392_s18, %s4193_s18  }
   0x7   : > { %p42_p0 = scmp.ne.s32.totalorder %s3341_s19, %s3337_s18  ;;  %p4157_p1 = scmp.eq.s32.totalorder %s3413_s22, 0 }
   0x8   : > { %p156_p3 = scmp.eq.s32.totalorder %s2513_s23, 3  ;;  %p2514_p5 = scmp.ge.s32.totalorder %s3349_s21, 1 }
   0x9   : > { %p3422_p4 = por %p4157_p1, %p42_p0  ;;  %p163_p7 = scmp.lt.s32.totalorder %s3349_s21, 5 }
   0xa   : > { %p3427_p6 = por %p156_p3, %p42_p0  ;;  %s3351_s27 = smov [#allocation5]  }
   0xb   : > { %s4169_s24 = scalar_select %p3422_p4, 1, 0 }
   0xc   : > { %s4170_s25 = scalar_select %p3427_p6, 1, 0 }
   0xd   : > { %p3432_p8 = pnand %p2514_p5, %p163_p7  ;;  %s175_s28 = sshll.u32 %s3351_s27, 4  ;;  %s176_s28 = int_to_ptr.vmem [resolvable:$true] %s175_s28 }
   0xe   : > { %s3352_s30 = smov [#allocation7]   ;;  %s3193_s9 = scalar_lea.hbm %s4152_s1, 2048 }
   0xf   : > { %s4171_s26 = scalar_select %p3432_p8, 1, 0 }
  0x10   : > { %p2851_p9 = pneg %p3432_p8  ;;  %s191_s6 = sshll.u32 %s3352_s30, 4  ;;  %s3444_s6 = int_to_ptr.vmem [resolvable:$true] %s191_s6 }
  0x11   : > { %p3194_p11 = scmp.ne.s32.totalorder %s4152_s1, %s3193_s9  ;;  %p3200_p3 = scmp.lt.u32.totalorder %s3193_s9, %s4152_s1 }
  0x12   : > { %p3440_p10 = pnand %p2851_p9, %p4157_p1 }
  0x14   : > { %p3195_p12 = pneg %p3440_p10 }
  0x16   : > { %p3196_p13 = pnand %p3195_p12, %p3194_p11 }
  0x18   : > { %p3197_p0 = pneg %p3196_p13 }
  0x1a   : > { %p3202_p5 = pnand %p3200_p3, %p3197_p0 }
  0x1c   : > { %3205 = shalt.err (!%p3202_p5)
}
  0x1d   : > { %s3206_s14 = scalar_lea.vmem %s176_s28, 2048  ;;  %p3214_p2 = scmp.lt.s32.totalorder %s176_s28, %s176_s28 }
  0x1e   : > { %p3207_p7 = scmp.ne.s32.totalorder %s176_s28, %s3206_s14  ;;  %p3215_p6 = scmp.lt.s32.totalorder %s3206_s14, %s3206_s14 }
  0x20   : > { %p3209_p9 = pnand %p3207_p7, %p3195_p12  ;;  %p3216_p4 = por %p3215_p6, %p3214_p2 }
  0x22   : > { %p3210_p1 = pneg %p3209_p9 }
  0x24   : > { %p3217_p8 = pnand %p3216_p4, %p3210_p1 }
  0x26   : > { %3220 = shalt.err (!%p3217_p8)
}
  0x27   : > { %s3353_s15 = smov 128   ;;  %s3354_s16 = smov 8  }
  0x28   : > { %2854 = dma.hbm_to_vmem [thread:$0]  (!%p3440_p10), %s4152_s1, 2048, %s176_s28, [#allocation6], %s3353_s15, %s3353_s15, %s3354_s16  }
  0x29   : > { %s3221_s7 = scalar_lea.hbm %s4154_s3, 16384 }
  0x2a   : > { %p3222_p1 = scmp.ne.s32.totalorder %s4154_s3, %s3221_s7  ;;  %p3228_p6 = scmp.lt.u32.totalorder %s3221_s7, %s4154_s3 }
  0x2c   : > { %p3224_p2 = pnand %p3222_p1, %p3195_p12 }
  0x2e   : > { %p3225_p4 = pneg %p3224_p2 }
  0x30   : > { %p3230_p8 = pnand %p3228_p6, %p3225_p4 }
  0x32   : > { %3233 = shalt.err (!%p3230_p8)
}
  0x33   : > { %s3234_s28 = scalar_lea.vmem %s3444_s6, 16384  ;;  %p3242_p3 = scmp.lt.s32.totalorder %s3444_s6, %s3444_s6 }
  0x34   : > { %p3235_p11 = scmp.ne.s32.totalorder %s3444_s6, %s3234_s28  ;;  %p3243_p5 = scmp.lt.s32.totalorder %s3234_s28, %s3234_s28 }
  0x36   : > { %p3237_p13 = pnand %p3235_p11, %p3195_p12  ;;  %p3244_p7 = por %p3243_p5, %p3242_p3 }
  0x38   : > { %p3238_p0 = pneg %p3237_p13 }
  0x3a   : > { %p3245_p9 = pnand %p3244_p7, %p3238_p0 }
  0x3c   : > { %3248 = shalt.err (!%p3245_p9)
}
  0x3d   : > { %s3355_s12 = smov 512   ;;  %s3356_s13 = smov 32  }
  0x3e   : > { %2857 = dma.hbm_to_vmem [thread:$0]  (!%p3440_p10), %s4154_s3, 16384, %s3444_s6, [#allocation6], %s3355_s12, %s3355_s12, %s3356_s13  }
  0x3f   : > { %s3497_s23 = sadd.s32 1, %s3349_s21   ;;  %s29_s30 = sadd.s32 1, %s3345_s20 }
  0x40   : > { %s26_s27 = ssub.s32 %s3349_s21, %s3497_s23  ;;  %p36_p1 = scmp.ne.s32.totalorder %s3345_s20, %s3341_s19 }
  0x41   : > { %p27_p12 = scmp.eq.s32.totalorder %s26_s27, 0  ;;  %p37_p2 = scmp.eq.s32.totalorder %s3349_s21, 0 }
  0x42   : > { %p4173_p6 = scmp.eq.s32.totalorder %s3413_s22, 3  ;;  %p2868_p11 = scmp.lt.s32.totalorder %s3349_s21, 4 }
  0x43   : > { %s3506_s7 = scalar_select %p27_p12, %s3345_s20, %s29_s30  }
  0x44   : > { %p38_p4 = por %p37_p2, %p36_p1  ;;  %p3510_p8 = por %p4173_p6, %p36_p1 }
  0x45   : > { %s208_s29 = sand.u32 1, %s3345_s20   ;;  %s2740_s6 = sshll.u32 %s3349_s21, 11 }
  0x46   : > { %s2518_s9 = sshll.u32 %s208_s29, 7  ;;  %s3520_s28 = scalar_lea.hbm %s4151_s0, %s2740_s6 }
  0x47   : > { %s212_s12 = scalar_lea.vmem [#allocation2], %s2518_s9  ;;  %p3524_p10 = pnand %p2868_p11, %p38_p4 }
  0x48   : > { %s219_s13 = sshll.u32 %s212_s12, 4  ;;  %s3528_s17 = scalar_lea.sflag [#allocation3], %s208_s29  ;;  %s3522_s13 = int_to_ptr.vmem [resolvable:$true] %s219_s13 }
  0x49   : > { %s3249_s27 = scalar_lea.hbm %s3520_s28, 2048  ;;  %p3251_p0 = pneg %p3524_p10 }
  0x4a   : > { %p3250_p13 = scmp.ne.s32.totalorder %s3520_s28, %s3249_s27  ;;  %s3254_s6 = scalar_lea.hbm %s4151_s0, 8192 }
  0x4b   : > { %p3255_p7 = scmp.lt.u32.totalorder %s3520_s28, %s4151_s0  ;;  %p3256_p9 = scmp.lt.u32.totalorder %s3254_s6, %s3249_s27 }
  0x4c   : > { %p3252_p3 = pnand %p3251_p0, %p3250_p13  ;;  %p3258_p1 = scmp.lt.u32.totalorder %s3249_s27, %s3520_s28 }
  0x4d   : > { %p3257_p12 = por %p3256_p9, %p3255_p7 }
  0x4e   : > { %p3253_p5 = pneg %p3252_p3 }
  0x4f   : > { %p3259_p2 = por %p3258_p1, %p3257_p12 }
  0x51   : > { %p3260_p4 = pnand %p3259_p2, %p3253_p5 }
  0x53   : > { %3263 = shalt.err (!%p3260_p4)
}
  0x54   : > { %s3264_s29 = scalar_lea.vmem %s3522_s13, 2048  ;;  %s3357_s12 = smov [#allocation2]  }
  0x55   : > { %p3265_p6 = scmp.ne.s32.totalorder %s3522_s13, %s3264_s29  ;;  %s3269_s30 = sshll.u32 %s3357_s12, 4  ;;  %s3270_s30 = int_to_ptr.vmem [resolvable:$false] %s3269_s30 }
  0x56   : > { %s3271_s9 = scalar_lea.vmem %s3270_s30, 4096  ;;  %p3272_p3 = scmp.lt.s32.totalorder %s3522_s13, %s3270_s30 }
  0x57   : > { %p3267_p11 = pnand %p3265_p6, %p3251_p0  ;;  %p3273_p7 = scmp.lt.s32.totalorder %s3271_s9, %s3264_s29 }
  0x59   : > { %p3268_p13 = pneg %p3267_p11  ;;  %p3274_p9 = por %p3273_p7, %p3272_p3 }
  0x5b   : > { %p3275_p12 = pnand %p3274_p9, %p3268_p13 }
  0x5d   : > { %3278 = shalt.err (!%p3275_p12)
}
  0x5e   : > { %2861 = dma.hbm_to_vmem [thread:$0]  (!%p3524_p10), %s3520_s28, 2048, %s3522_s13, %s3528_s17, %s3353_s15, %s3353_s15, %s3354_s16  }
  0x5f   : > { %p4176_p0 = scmp.ne.s32.totalorder %s4171_s26, 0 }
  0x61   : > { %231 = sbr.rel (%p4176_p0) target bundleno = 747 (0x2eb), region = 40 }
  0x68   : > { %s3562_s27 = sand.u32 1, %s3341_s19   ;;  %p4177_p5 = scmp.ne.s32.totalorder %s4169_s24, 0 }
  0x69   : > { %s2522_s6 = sshll.u32 %s3562_s27, 7  ;;  %s234_s10 = scalar_lea.sflag [#allocation3], %s3562_s27 }
  0x6a   : > { %s3566_s11 = scalar_lea.vmem [#allocation2], %s2522_s6 }
  0x6b   : > { %3324 = dma.done.wait (%p4177_p5), %s234_s10, 2048  }
  0x6c   : > { %3326 = vsyncadd (%p4177_p5), %s234_s10, 4294965248  ;;  %p4178_p10 = scmp.eq.s32.totalorder %s3413_s22, 0 }
  0x6e   : > { %3328 = dma.done.wait (%p4178_p10), [#allocation6], 18432   ;;  %p4179_p1 = pmov %p4178_p10 }
  0x6f   : > { %v3358_v0 = vmov 0   ;;  %v2913_v1 = vld [vmem:[#allocation5 + $0x4] ss:$8 sps:$4 sm:$0xff]   ;;  %v2915_v2 = vld [vmem:[#allocation5] ss:$8 sps:$4 sm:$0xff]   ;;  %v277_v54 = vld [vmem:[%s3566_s11 + $0x10] sm:$0xff] }
  0x70   : > { %3330 = vsyncadd (%p4179_p1), [#allocation6], 4294948864  ;;  %439 = vmatprep.mubr.bf16.mxu0 %v3358_v0  ;;  %407 = vmatprep.subr.bf16.mxu0 %v2913_v1  ;;  %v2916_v3 = vld [vmem:[#allocation5 + $0x14] ss:$8 sps:$4 sm:$0xff]   ;;  %v2918_v4 = vld [vmem:[#allocation5 + $0x10] ss:$8 sps:$4 sm:$0xff]  }
  0x71   : > { %408 = vmatpush1.bf16.msra.mxu0 %v2915_v2  ;;  %v2919_v5 = vld [vmem:[#allocation5 + $0x24] ss:$8 sps:$4 sm:$0xff]   ;;  %v2921_v6 = vld [vmem:[#allocation5 + $0x20] ss:$8 sps:$4 sm:$0xff]   ;;  %v2922_v7 = vld [vmem:[#allocation5 + $0x34] ss:$8 sps:$4 sm:$0xff]  }
  0x72   : > { %409 = vmatprep.subr.bf16.mxu0 %v2916_v3  ;;  %v2924_v8 = vld [vmem:[#allocation5 + $0x30] ss:$8 sps:$4 sm:$0xff]   ;;  %v2925_v9 = vld [vmem:[#allocation5 + $0x44] ss:$8 sps:$4 sm:$0xff]   ;;  %v2927_v10 = vld [vmem:[#allocation5 + $0x40] ss:$8 sps:$4 sm:$0xff]  }
  0x73   : > { %v2928_v11 = vld [vmem:[#allocation5 + $0x54] ss:$8 sps:$4 sm:$0xff]   ;;  %v568_v12 = vld [vmem:[#allocation7] sm:$0xff]  ;;  %v2930_v20 = vld [vmem:[#allocation5 + $0x50] ss:$8 sps:$4 sm:$0xff]   ;;  %s2525_s28 = sshll.u32 %s3562_s27, 9 }
  0x74   : > { %v572_v13 = vld [vmem:[#allocation7 + $0x20] sm:$0xff]  ;;  %v2934_v28 = vld [vmem:[#allocation5 + $0x74] ss:$8 sps:$4 sm:$0xff]   ;;  %v569_v30 = vld [vmem:[#allocation7 + $0x8] sm:$0xff]  ;;  %s3909_s13 = scalar_lea.vmem [#allocation8], %s2525_s28  ;;  %s2806_s14 = sshll.u32 %s3413_s22, 13 }
  0x75   : > { %410 = vmatpush1.bf16.msra.mxu0 %v2918_v4  ;;  %v2543_v14 = vcombine.high %v568_v12, %v572_v13  ;;  %v2542_v15 = vcombine.low %v568_v12, %v572_v13  ;;  %v576_v16 = vld [vmem:[#allocation7 + $0x40] sm:$0xff]  ;;  %v573_v31 = vld [vmem:[#allocation7 + $0x28] sm:$0xff]  ;;  %v2936_v35 = vld [vmem:[#allocation5 + $0x70] ss:$8 sps:$4 sm:$0xff]   ;;  %s2421_s17 = sshll.u32 %s3909_s13, 4  ;;  %s4104_s30 = scalar_lea.hbm %s4156_s5, %s2806_s14  ;;  %s4106_s17 = int_to_ptr.vmem [resolvable:$true] %s2421_s17 }
  0x76   : > { %411 = vmatprep.subr.bf16.mxu0 %v2919_v5  ;;  %v580_v17 = vld [vmem:[#allocation7 + $0x60] sm:$0xff]  ;;  %v276_v37 = vld [vmem:[%s3566_s11 + $0x8] sm:$0xff]  ;;  %v2545_v38 = vcombine.high %v569_v30, %v573_v31  ;;  %v2544_v46 = vcombine.low %v569_v30, %v573_v31  ;;  %v278_v55 = vld [vmem:[%s3566_s11 + $0x18] sm:$0xff]  ;;  %s2407_s9 = scalar_lea.sflag [#allocation4], %s3562_s27  ;;  %s3279_s22 = scalar_lea.vmem %s4106_s17, 8192 }
  0x77   : > { %v2551_v18 = vcombine.high %v576_v16, %v580_v17  ;;  %v584_v19 = vld [vmem:[#allocation7 + $0x80] sm:$0xff]  ;;  %1378 = vmatprep.subr.bf16.mxu1 %v2543_v14  ;;  %v2550_v23 = vcombine.low %v576_v16, %v580_v17  ;;  %v577_v40 = vld [vmem:[#allocation7 + $0x48] sm:$0xff]  ;;  %v292_v62 = vpack.c.bf16 %v278_v55, %v277_v54  ;;  %v282_v30 = vld [vmem:[%s3566_s11 + $0x38] sm:$0xff]  ;;  %p3280_p2 = scmp.ne.s32.totalorder %s4106_s17, %s3279_s22  ;;  %s3359_s6 = smov [#allocation8]  }
  0x78   : > { %v588_v21 = vld [vmem:[#allocation7 + $0xa0] sm:$0xff]  ;;  %1379 = vmatpush1.bf16.msra.mxu1 %v2542_v15  ;;  %v581_v41 = vld [vmem:[#allocation7 + $0x68] sm:$0xff]  ;;  %s3283_s10 = sshll.u32 %s3359_s6, 4  ;;  %s3284_s10 = int_to_ptr.vmem [resolvable:$false] %s3283_s10 }
  0x79   : > { %412 = vmatpush1.bf16.msra.mxu0 %v2921_v6  ;;  %v2931_v22 = vld [vmem:[#allocation5 + $0x64] ss:$8 sps:$4 sm:$0xff]   ;;  %1380 = vmatprep.subr.bf16.mxu1 %v2551_v18  ;;  %v2559_v24 = vcombine.high %v584_v19, %v588_v21  ;;  %v2933_v27 = vld [vmem:[#allocation5 + $0x60] ss:$8 sps:$4 sm:$0xff]   ;;  %v2558_v29 = vcombine.low %v584_v19, %v588_v21  ;;  %v2553_v47 = vcombine.high %v577_v40, %v581_v41  ;;  %p3281_p4 = pnand %p3280_p2, %p3510_p8  ;;  %p3286_p11 = scmp.lt.s32.totalorder %s4106_s17, %s3284_s10 }
  0x7a   : > { %413 = vmatprep.subr.bf16.mxu0 %v2922_v7  ;;  %v592_v25 = vld [vmem:[#allocation7 + $0xc0] sm:$0xff]  ;;  %v585_v49 = vld [vmem:[#allocation7 + $0x88] sm:$0xff]  ;;  %v2552_v56 = vcombine.low %v577_v40, %v581_v41 }
  0x7b   : > { %v596_v26 = vld [vmem:[#allocation7 + $0xe0] sm:$0xff]  ;;  %v589_v50 = vld [vmem:[#allocation7 + $0xa8] sm:$0xff]  ;;  %p3282_p6 = pneg %p3281_p4 }
  0x7c   : > { %1381 = vmatpush1.bf16.msra.mxu1 %v2550_v23  ;;  %v2567_v32 = vcombine.high %v592_v25, %v596_v26  ;;  %v600_v33 = vld [vmem:[#allocation7 + $0x100] sm:$0xff]  ;;  %v2566_v39 = vcombine.low %v592_v25, %v596_v26  ;;  %v2561_v57 = vcombine.high %v585_v49, %v589_v50  ;;  %v593_v59 = vld [vmem:[#allocation7 + $0xc8] sm:$0xff]  ;;  %v2560_v2 = vcombine.low %v585_v49, %v589_v50 }
  0x7d   : > { %414 = vmatpush1.bf16.msra.mxu0 %v2924_v8  ;;  %1382 = vmatprep.subr.bf16.mxu1 %v2559_v24  ;;  %v604_v34 = vld [vmem:[#allocation7 + $0x120] sm:$0xff]  ;;  %v597_v60 = vld [vmem:[#allocation7 + $0xe8] sm:$0xff] }
  0x7e   : > { %415 = vmatprep.subr.bf16.mxu0 %v2925_v9  ;;  %v275_v36 = vld [vmem:[%s3566_s11] sm:$0xff]  ;;  %v2575_v42 = vcombine.high %v600_v33, %v604_v34  ;;  %v2574_v48 = vcombine.low %v600_v33, %v604_v34  ;;  %v2569_v3 = vcombine.high %v593_v59, %v597_v60  ;;  %v601_v5 = vld [vmem:[#allocation7 + $0x108] sm:$0xff]  ;;  %v2568_v12 = vcombine.low %v593_v59, %v597_v60 }
  0x7f   : > { %v291_v43 = vpack.c.bf16 %v276_v37, %v275_v36  ;;  %v608_v44 = vld [vmem:[#allocation7 + $0x140] sm:$0xff]  ;;  %v605_v6 = vld [vmem:[#allocation7 + $0x128] sm:$0xff] }
  0x80   : > { %1383 = vmatpush1.bf16.msra.mxu1 %v2558_v29  ;;  %v612_v45 = vld [vmem:[#allocation7 + $0x160] sm:$0xff]  ;;  %v2577_v13 = vcombine.high %v601_v5, %v605_v6  ;;  %v609_v15 = vld [vmem:[#allocation7 + $0x148] sm:$0xff]  ;;  %v2576_v21 = vcombine.low %v601_v5, %v605_v6  ;;  %v281_v29 = vld [vmem:[%s3566_s11 + $0x30] sm:$0xff] }
  0x81   : > { %416 = vmatpush1.bf16.msra.mxu0 %v2927_v10  ;;  %1384 = vmatprep.subr.bf16.mxu1 %v2567_v32  ;;  %v2583_v51 = vcombine.high %v608_v44, %v612_v45  ;;  %v616_v52 = vld [vmem:[#allocation7 + $0x180] sm:$0xff]  ;;  %v2582_v58 = vcombine.low %v608_v44, %v612_v45  ;;  %v613_v16 = vld [vmem:[#allocation7 + $0x168] sm:$0xff]  ;;  %v294_v37 = vpack.c.bf16 %v282_v30, %v281_v29 }
  0x82   : > { %417 = vmatprep.subr.bf16.mxu0 %v2928_v11  ;;  %v620_v53 = vld [vmem:[#allocation7 + $0x1a0] sm:$0xff]  ;;  %v280_v11 = vld [vmem:[%s3566_s11 + $0x28] sm:$0xff]  ;;  %v2584_v31 = vcombine.low %v609_v15, %v613_v16 }
  0x83   : > { %v2591_v61 = vcombine.high %v616_v52, %v620_v53  ;;  %v624_v63 = vld [vmem:[#allocation7 + $0x1c0] sm:$0xff]  ;;  %v2590_v4 = vcombine.low %v616_v52, %v620_v53  ;;  %v617_v24 = vld [vmem:[#allocation7 + $0x188] sm:$0xff] }
  0x84   : > { %1385 = vmatpush1.bf16.msra.mxu1 %v2566_v39  ;;  %v628_v1 = vld [vmem:[#allocation7 + $0x1e0] sm:$0xff]  ;;  %v621_v25 = vld [vmem:[#allocation7 + $0x1a8] sm:$0xff] }
  0x85   : > { %418 = vmatpush1.bf16.msra.mxu0 %v2930_v20  ;;  %1386 = vmatprep.subr.bf16.mxu1 %v2575_v42  ;;  %v2599_v7 = vcombine.high %v624_v63, %v628_v1  ;;  %v632_v8 = vld [vmem:[#allocation7 + $0x200] sm:$0xff]  ;;  %v2598_v14 = vcombine.low %v624_v63, %v628_v1  ;;  %v2593_v32 = vcombine.high %v617_v24, %v621_v25  ;;  %v625_v34 = vld [vmem:[#allocation7 + $0x1c8] sm:$0xff] }
  0x86   : > { %419 = vmatprep.subr.bf16.mxu0 %v2931_v22  ;;  %v636_v9 = vld [vmem:[#allocation7 + $0x220] sm:$0xff]  ;;  %v2585_v22 = vcombine.high %v609_v15, %v613_v16  ;;  %v2592_v40 = vcombine.low %v617_v24, %v621_v25  ;;  %v637_v44 = vld [vmem:[#allocation7 + $0x228] sm:$0xff]  ;;  %v290_v24 = vld [vmem:[%s3566_s11 + $0x78] sm:$0xff] }
  0x87   : > { %v279_v10 = vld [vmem:[%s3566_s11 + $0x20] sm:$0xff]  ;;  %v2607_v17 = vcombine.high %v632_v8, %v636_v9  ;;  %v2606_v23 = vcombine.low %v632_v8, %v636_v9  ;;  %v284_v49 = vld [vmem:[%s3566_s11 + $0x48] sm:$0xff] }
  0x88   : > { %1387 = vmatpush1.bf16.msra.mxu1 %v2574_v48  ;;  %v293_v18 = vpack.c.bf16 %v280_v11, %v279_v10  ;;  %v640_v19 = vld [vmem:[#allocation7 + $0x240] sm:$0xff]  ;;  %v641_v53 = vld [vmem:[#allocation7 + $0x248] sm:$0xff] }
  0x89   : > { %420 = vmatpush1.bf16.msra.mxu0 %v2933_v27  ;;  %1388 = vmatprep.subr.bf16.mxu1 %v2583_v51  ;;  %v644_v20 = vld [vmem:[#allocation7 + $0x260] sm:$0xff]  ;;  %v645_v54 = vld [vmem:[#allocation7 + $0x268] sm:$0xff] }
  0x8a   : > { %421 = vmatprep.subr.bf16.mxu0 %v2934_v28  ;;  %v2615_v26 = vcombine.high %v640_v19, %v644_v20  ;;  %v648_v27 = vld [vmem:[#allocation7 + $0x280] sm:$0xff]  ;;  %v2614_v33 = vcombine.low %v640_v19, %v644_v20  ;;  %v2617_v60 = vcombine.high %v641_v53, %v645_v54  ;;  %v653_v63 = vld [vmem:[#allocation7 + $0x2a8] sm:$0xff] }
  0x8b   : > { %v652_v28 = vld [vmem:[#allocation7 + $0x2a0] sm:$0xff]  ;;  %v661_v8 = vld [vmem:[#allocation7 + $0x2e8] sm:$0xff] }
  0x8c   : > { %1389 = vmatpush1.bf16.msra.mxu1 %v2582_v58  ;;  %v2623_v36 = vcombine.high %v648_v27, %v652_v28  ;;  %v660_v39 = vld [vmem:[#allocation7 + $0x2e0] sm:$0xff]  ;;  %v2622_v42 = vcombine.low %v648_v27, %v652_v28  ;;  %v288_v15 = vld [vmem:[%s3566_s11 + $0x68] sm:$0xff] }
  0x8d   : > { %422 = vmatpush1.bf16.msra.mxu0 %v2936_v35  ;;  %1390 = vmatprep.subr.bf16.mxu1 %v2591_v61  ;;  %v629_v35 = vld [vmem:[#allocation7 + $0x1e8] sm:$0xff]  ;;  %v283_v48 = vld [vmem:[%s3566_s11 + $0x40] sm:$0xff] }
  0x8e   : > { %1491 = vmatprep.subr.bf16.mxu0 %v2545_v38  ;;  %v656_v38 = vld [vmem:[#allocation7 + $0x2c0] sm:$0xff]  ;;  %v2601_v41 = vcombine.high %v625_v34, %v629_v35  ;;  %v2600_v50 = vcombine.low %v625_v34, %v629_v35  ;;  %v677_v19 = vld [vmem:[#allocation7 + $0x368] sm:$0xff] }
  0x8f   : > { %v2631_v45 = vcombine.high %v656_v38, %v660_v39  ;;  %v2630_v52 = vcombine.low %v656_v38, %v660_v39  ;;  %v676_v58 = vld [vmem:[#allocation7 + $0x360] sm:$0xff]  ;;  %v681_v29 = vld [vmem:[#allocation7 + $0x388] sm:$0xff] }
  0x90   : > { %440 = vmatmul.mubr.bf16.vlgmr.msra.gmra.mrb[0].mxu0 %v291_v43  ;;  %1391 = vmatpush1.bf16.msra.mxu1 %v2590_v4  ;;  %v633_v43 = vld [vmem:[#allocation7 + $0x208] sm:$0xff]  ;;  %v2616_v4 = vcombine.low %v641_v53, %v645_v54  ;;  %v680_v27 = vld [vmem:[#allocation7 + $0x380] sm:$0xff] }
  0x91   : > { %449 = vmatprep.mubr.bf16.mxu0 %v3358_v0  ;;  %1492 = vmatpush1.bf16.msra.mxu0 %v2544_v46  ;;  %v664_v46 = vld [vmem:[#allocation7 + $0x300] sm:$0xff]  ;;  %v2609_v51 = vcombine.high %v633_v43, %v637_v44  ;;  %v2608_v59 = vcombine.low %v633_v43, %v637_v44  ;;  %v693_v38 = vld [vmem:[#allocation7 + $0x3e8] sm:$0xff]  ;;  %v574_v43 = vld [vmem:[#allocation7 + $0x30] sm:$0xff] }
  0x92   : > { %1493 = vmatprep.subr.bf16.mxu0 %v2553_v47  ;;  %1392 = vmatprep.subr.bf16.mxu1 %v2599_v7  ;;  %v668_v47 = vld [vmem:[#allocation7 + $0x320] sm:$0xff]  ;;  %v657_v7 = vld [vmem:[#allocation7 + $0x2c8] sm:$0xff]  ;;  %v571_v44 = vld [vmem:[#allocation7 + $0x18] sm:$0xff] }
  0x93   : > { %v2639_v55 = vcombine.high %v664_v46, %v668_v47  ;;  %v2638_v61 = vcombine.low %v664_v46, %v668_v47  ;;  %v2633_v11 = vcombine.high %v657_v7, %v661_v8  ;;  %v2632_v16 = vcombine.low %v657_v7, %v661_v8  ;;  %v684_v28 = vld [vmem:[#allocation7 + $0x3a0] sm:$0xff]  ;;  %v575_v46 = vld [vmem:[#allocation7 + $0x38] sm:$0xff]  ;;  %v582_v7 = vld [vmem:[#allocation7 + $0x70] sm:$0xff] }
  0x94   : > { %1393 = vmatpush1.bf16.msra.mxu1 %v2598_v14  ;;  %v287_v14 = vld [vmem:[%s3566_s11 + $0x60] sm:$0xff]  ;;  %v2655_v30 = vcombine.high %v680_v27, %v684_v28  ;;  %v579_v8 = vld [vmem:[#allocation7 + $0x58] sm:$0xff] }
  0x95   : > { %1494 = vmatpush1.bf16.msra.mxu0 %v2552_v56  ;;  %1394 = vmatprep.subr.bf16.mxu1 %v2607_v17  ;;  %v295_v56 = vpack.c.bf16 %v284_v49, %v283_v48  ;;  %v297_v20 = vpack.c.bf16 %v288_v15, %v287_v14  ;;  %v692_v35 = vld [vmem:[#allocation7 + $0x3e0] sm:$0xff]  ;;  %v3600_v48 = vcombine.low %v571_v44, %v575_v46 }
  0x96   : > { %1495 = vmatprep.subr.bf16.mxu0 %v2561_v57  ;;  %v672_v57 = vld [vmem:[#allocation7 + $0x340] sm:$0xff]  ;;  %v3602_v49 = vcombine.high %v571_v44, %v575_v46  ;;  %v602_v46 = vld [vmem:[#allocation7 + $0x110] sm:$0xff] }
  0x97   : > { %v2647_v1 = vcombine.high %v672_v57, %v676_v58  ;;  %v2646_v6 = vcombine.low %v672_v57, %v676_v58  ;;  %v315_v53 = vld [vmem:[%s4153_s2] sm:$0x3] }
  0x98   : > { %450 = vmatmul.mubr.bf16.gmra.mrb[4].mxu0 %v292_v62  ;;  %1395 = vmatpush1.bf16.msra.mxu1 %v2606_v23  ;;  %v649_v62 = vld [vmem:[#allocation7 + $0x288] sm:$0xff]  ;;  %v289_v23 = vld [vmem:[%s3566_s11 + $0x70] sm:$0xff] }
  0x99   : > { %459 = vmatprep.mubr.bf16.mxu0 %v3358_v0  ;;  %1496 = vmatpush1.bf16.msra.mxu0 %v2560_v2  ;;  %v285_v2 = vld [vmem:[%s3566_s11 + $0x50] sm:$0xff]  ;;  %v2625_v5 = vcombine.high %v649_v62, %v653_v63  ;;  %v2624_v10 = vcombine.low %v649_v62, %v653_v63 }
  0x9a   : > { %1497 = vmatprep.subr.bf16.mxu0 %v2569_v3  ;;  %1396 = vmatprep.subr.bf16.mxu1 %v2615_v26  ;;  %v286_v3 = vld [vmem:[%s3566_s11 + $0x58] sm:$0xff]  ;;  %v298_v26 = vpack.c.bf16 %v290_v24, %v289_v23  ;;  %s3285_s11 = scalar_lea.vmem %s3284_s10, 16384 }
  0x9b   : > { %v296_v9 = vpack.c.bf16 %v286_v3, %v285_v2  ;;  %p3287_p13 = scmp.lt.s32.totalorder %s3285_s11, %s3279_s22 }
  0x9c   : > { %1397 = vmatpush1.bf16.msra.mxu1 %v2614_v33 }
  0x9d   : > { %1498 = vmatpush1.bf16.msra.mxu0 %v2568_v12  ;;  %1398 = vmatprep.subr.bf16.mxu1 %v2623_v36  ;;  %v665_v12 = vld [vmem:[#allocation7 + $0x308] sm:$0xff]  ;;  %p3288_p3 = por %p3287_p13, %p3286_p11 }
  0x9e   : > { %1499 = vmatprep.subr.bf16.mxu0 %v2577_v13  ;;  %v669_v13 = vld [vmem:[#allocation7 + $0x328] sm:$0xff] }
  0x9f   : > { %v2641_v17 = vcombine.high %v665_v12, %v669_v13  ;;  %v689_v36 = vld [vmem:[#allocation7 + $0x3c8] sm:$0xff]  ;;  %p3289_p7 = pnand %p3288_p3, %p3282_p6 }
  0xa0   : > { %460 = vmatmul.mubr.bf16.gmra.mrb[8].mxu0 %v293_v18  ;;  %1399 = vmatpush1.bf16.msra.mxu1 %v2622_v42  ;;  %v673_v18 = vld [vmem:[#allocation7 + $0x348] sm:$0xff]  ;;  %v570_v42 = vld [vmem:[#allocation7 + $0x10] sm:$0xff] }
  0xa1   : > { %469 = vmatprep.mubr.bf16.mxu0 %v3358_v0  ;;  %1500 = vmatpush1.bf16.msra.mxu0 %v2576_v21  ;;  %v2640_v21 = vcombine.low %v665_v12, %v669_v13  ;;  %v2648_v25 = vcombine.low %v673_v18, %v677_v19  ;;  %v2546_v47 = vcombine.low %v570_v42, %v574_v43 }
  0xa2   : > { %1501 = vmatprep.subr.bf16.mxu0 %v2585_v22  ;;  %1400 = vmatprep.subr.bf16.mxu1 %v2631_v45  ;;  %v2649_v22 = vcombine.high %v673_v18, %v677_v19  ;;  %v2547_v45 = vcombine.high %v570_v42, %v574_v43 }
  0xa4   : > { %1401 = vmatpush1.bf16.msra.mxu1 %v2630_v52 }
  0xa5   : > { %1502 = vmatpush1.bf16.msra.mxu0 %v2584_v31  ;;  %1402 = vmatprep.subr.bf16.mxu1 %v2639_v55  ;;  %v685_v31 = vld [vmem:[#allocation7 + $0x3a8] sm:$0xff] }
  0xa6   : > { %1503 = vmatprep.subr.bf16.mxu0 %v2593_v32  ;;  %v2654_v32 = vcombine.low %v680_v27, %v684_v28  ;;  %v2656_v33 = vcombine.low %v681_v29, %v685_v31  ;;  %v2657_v34 = vcombine.high %v681_v29, %v685_v31 }
  0xa8   : > { %470 = vmatmul.mubr.bf16.gmra.mrb[12].mxu0 %v294_v37  ;;  %1403 = vmatpush1.bf16.msra.mxu1 %v2638_v61 }
  0xa9   : > { %479 = vmatprep.mubr.bf16.mxu0 %v3358_v0  ;;  %1504 = vmatpush1.bf16.msra.mxu0 %v2592_v40  ;;  %v2664_v40 = vcombine.low %v689_v36, %v693_v38 }
  0xaa   : > { %1505 = vmatprep.subr.bf16.mxu0 %v2601_v41  ;;  %1404 = vmatprep.subr.bf16.mxu1 %v2647_v1  ;;  %v2665_v41 = vcombine.high %v689_v36, %v693_v38  ;;  %v599_v36 = vld [vmem:[#allocation7 + $0xf8] sm:$0xff] }
  0xac   : > { %1405 = vmatpush1.bf16.msra.mxu1 %v2646_v6 }
  0xad   : > { %1506 = vmatpush1.bf16.msra.mxu0 %v2600_v50  ;;  %1406 = vmatprep.subr.bf16.mxu1 %v2655_v30  ;;  %v317_v50 = vlaneseq }
  0xae   : > { %1507 = vmatprep.subr.bf16.mxu0 %v2609_v51 }
  0xaf   : > { %v3605_v51 = vshrl.u32 %v317_v50, 7 }
  0xb0   : > { %480 = vmatmul.mubr.bf16.gmra.mrb[16].mxu0 %v295_v56  ;;  %1407 = vmatpush1.bf16.msra.mxu1 %v2654_v32  ;;  %v594_v32 = vld [vmem:[#allocation7 + $0xd0] sm:$0xff] }
  0xb1   : > { %489 = vmatprep.mubr.bf16.mxu0 %v3358_v0  ;;  %1508 = vmatpush1.bf16.msra.mxu0 %v2608_v59  ;;  %4180 = vst [vmem:[#allocation12_spill] sm:$0xff] %v3605_v51  ;;  %v4161_v52 = vsub.s32 0, %v3605_v51  ;;  %v4160_v54 = vsub.s32 1, %v3605_v51 }
  0xb2   : > { %1509 = vmatprep.subr.bf16.mxu0 %v2617_v60 }
  0xb3   : > { %v3614_v55 = vrot.slane %v315_v53, %v4161_v52  ;;  %v3618_v56 = vrot.slane %v315_v53, %v4160_v54  ;;  %v606_v53 = vld [vmem:[#allocation7 + $0x130] sm:$0xff]  ;;  %v675_v52 = vld [vmem:[#allocation7 + $0x358] sm:$0xff] }
  0xb4   : > { %v678_v54 = vld [vmem:[#allocation7 + $0x370] sm:$0xff] }
  0xb5   : > { %1510 = vmatpush1.bf16.msra.mxu0 %v2616_v4  ;;  %v578_v4 = vld [vmem:[#allocation7 + $0x50] sm:$0xff] }
  0xb6   : > { %1511 = vmatprep.subr.bf16.mxu0 %v2625_v5  ;;  %v2555_v15 = vcombine.high %v578_v4, %v582_v7 }
  0xb8   : > { %490 = vmatmul.mubr.bf16.gmra.mrb[20].mxu0 %v296_v9  ;;  %v583_v9 = vld [vmem:[#allocation7 + $0x78] sm:$0xff] }
  0xb9   : > { %499 = vmatprep.mubr.bf16.mxu0 %v3358_v0  ;;  %1512 = vmatpush1.bf16.msra.mxu0 %v2624_v10  ;;  %v3639_v27 = vcombine.low %v579_v8, %v583_v9 }
  0xba   : > { %1513 = vmatprep.subr.bf16.mxu0 %v2633_v11 }
  0xbd   : > { %1514 = vmatpush1.bf16.msra.mxu0 %v2632_v16  ;;  %v3629_v16 = vcombine.high %v579_v8, %v583_v9  ;;  %v614_v8 = vld [vmem:[#allocation7 + $0x170] sm:$0xff]  ;;  %v611_v9 = vld [vmem:[#allocation7 + $0x158] sm:$0xff] }
  0xbe   : > { %1515 = vmatprep.subr.bf16.mxu0 %v2641_v17  ;;  %v586_v17 = vld [vmem:[#allocation7 + $0x90] sm:$0xff] }
  0xc0   : > { %500 = vmatmul.mubr.bf16.gmra.mrb[24].mxu0 %v297_v20  ;;  %v590_v20 = vld [vmem:[#allocation7 + $0xb0] sm:$0xff] }
  0xc1   : > { %509 = vmatprep.mubr.bf16.mxu0 %v3358_v0  ;;  %1516 = vmatpush1.bf16.msra.mxu0 %v2640_v21  ;;  %v688_v0 = vld [vmem:[#allocation7 + $0x3c0] sm:$0xff]  ;;  %v587_v21 = vld [vmem:[#allocation7 + $0x98] sm:$0xff]  ;;  %v2563_v30 = vcombine.high %v586_v17, %v590_v20 }
  0xc2   : > { %1517 = vmatprep.subr.bf16.mxu0 %v2649_v22  ;;  %v2663_v37 = vcombine.high %v688_v0, %v692_v35  ;;  %v2662_v39 = vcombine.low %v688_v0, %v692_v35  ;;  %v591_v22 = vld [vmem:[#allocation7 + $0xb8] sm:$0xff]  ;;  %v598_v0 = vld [vmem:[#allocation7 + $0xf0] sm:$0xff] }
  0xc3   : > { %v3642_v31 = vcombine.high %v587_v21, %v591_v22  ;;  %v595_v35 = vld [vmem:[#allocation7 + $0xd8] sm:$0xff]  ;;  %v2571_v44 = vcombine.high %v594_v32, %v598_v0 }
  0xc4   : > { %1408 = vmatprep.subr.bf16.mxu1 %v2663_v37 }
  0xc5   : > { %1518 = vmatpush1.bf16.msra.mxu0 %v2648_v25  ;;  %1409 = vmatpush1.bf16.msra.mxu1 %v2662_v39 }
  0xc6   : > { %1519 = vmatprep.subr.bf16.mxu0 %v2657_v34  ;;  %1604 = vmatprep.subr.bf16.mxu1 %v2547_v45  ;;  %v3653_v45 = vcombine.high %v595_v35, %v599_v36 }
  0xc8   : > { %510 = vmatmul.mubr.bf16.gmra.mrb[28].mxu0 %v298_v26  ;;  %v2554_v26 = vcombine.low %v578_v4, %v582_v7 }
  0xc9   : > { %1520 = vmatpush1.bf16.msra.mxu0 %v2656_v33 }
  0xca   : > { %1521 = vmatprep.subr.bf16.mxu0 %v2665_v41  ;;  %v3649_v41 = vcombine.low %v587_v21, %v591_v22 }
  0xcd   : > { %1522 = vmatpush1.bf16.msra.mxu0 %v2664_v40  ;;  %v2562_v40 = vcombine.low %v586_v17, %v590_v20  ;;  %v2578_v17 = vcombine.low %v602_v46, %v606_v53 }
  0xce   : > { %1717 = vmatprep.subr.bf16.mxu0 %v3602_v49 }
 0x163   : > { %v441_v57 = vpop.f32.mrb[0].mxu0 }
 0x164   : > { %v442_v58 = vadd.f32 %v441_v57, %v3614_v55  ;;  %v443_v59 = vpop.f32.mrb[1].mxu0  ;;  %v603_v57 = vld [vmem:[#allocation7 + $0x118] sm:$0xff] }
 0x165   : > { %v444_v60 = vadd.f32 %v443_v59, %v3618_v56  ;;  %v445_v61 = vpop.f32.mrb[2].mxu0 }
 0x166   : > { %v446_v62 = vadd.f32 %v445_v61, %v3614_v55  ;;  %v447_v63 = vpop.f32.mrb[3].mxu0  ;;  %v520_v2 = vmax.f32 %v442_v58, 0.0  ;;  %v607_v58 = vld [vmem:[#allocation7 + $0x138] sm:$0xff] }
 0x167   : > { %v448_v1 = vadd.f32 %v447_v63, %v3618_v56  ;;  %v521_v5 = vmax.f32 %v444_v60, 0.0  ;;  %v3663_v63 = vcombine.low %v595_v35, %v599_v36  ;;  %v3666_v4 = vcombine.high %v603_v57, %v607_v58 }
 0x168   : > { %v522_v3 = vmax.f32 %v446_v62, 0.0  ;;  %v2570_v62 = vcombine.low %v594_v32, %v598_v0 }
 0x169   : > { %v523_v6 = vmax.f32 %v448_v1, 0.0 }
 0x16a   : > { %v3624_v10 = vpack.c.bf16 %v522_v3, %v520_v2  ;;  %v2579_v3 = vcombine.high %v602_v46, %v606_v53  ;;  %v630_v46 = vld [vmem:[#allocation7 + $0x1f0] sm:$0xff] }
 0x16b   : > { %v3626_v11 = vpack.c.bf16 %v523_v6, %v521_v5  ;;  %v451_v12 = vpop.f32.mrb[4].mxu0  ;;  %v610_v5 = vld [vmem:[#allocation7 + $0x150] sm:$0xff] }
 0x16c   : > { %v452_v13 = vadd.f32 %v451_v12, %v3614_v55  ;;  %v453_v14 = vpop.f32.mrb[5].mxu0  ;;  %v615_v12 = vld [vmem:[#allocation7 + $0x178] sm:$0xff]  ;;  %v2587_v21 = vcombine.high %v610_v5, %v614_v8 }
 0x16d   : > { %v454_v18 = vadd.f32 %v453_v14, %v3618_v56  ;;  %v455_v19 = vpop.f32.mrb[6].mxu0  ;;  %1410 = vmatprep.mubr.bf16.mxu1 %v3626_v11  ;;  %1523 = vmatprep.mubr.bf16.mxu0 %v3626_v11  ;;  %v3677_v22 = vcombine.high %v611_v9, %v615_v12  ;;  %v3687_v0 = vcombine.low %v611_v9, %v615_v12  ;;  %v639_v9 = vld [vmem:[#allocation7 + $0x238] sm:$0xff] }
 0x16e   : > { %v456_v23 = vadd.f32 %v455_v19, %v3614_v55  ;;  %v457_v24 = vpop.f32.mrb[7].mxu0  ;;  %1411 = vmatmul.mubr.bf16.vlgmr.msra.gmra.mrb[0].mxu1 %v3624_v10  ;;  %1524 = vmatmul.mubr.bf16.vlgmr.msra.gmra.mrb[32].mxu0 %v3624_v10  ;;  %v524_v28 = vmax.f32 %v452_v13, 0.0 }
 0x16f   : > { %v458_v25 = vadd.f32 %v457_v24, %v3618_v56  ;;  %1605 = vmatpush1.bf16.msra.mxu1 %v2546_v47  ;;  %1718 = vmatpush1.bf16.msra.mxu0 %v3600_v48  ;;  %v525_v33 = vmax.f32 %v454_v18, 0.0  ;;  %v3673_v18 = vcombine.low %v603_v57, %v607_v58 }
 0x170   : > { %v526_v29 = vmax.f32 %v456_v23, 0.0  ;;  %1606 = vmatprep.subr.bf16.mxu1 %v2555_v15  ;;  %1719 = vmatprep.subr.bf16.mxu0 %v3629_v16  ;;  %v618_v23 = vld [vmem:[#allocation7 + $0x190] sm:$0xff] }
 0x171   : > { %v527_v34 = vmax.f32 %v458_v25, 0.0 }
 0x172   : > { %v3644_v37 = vpack.c.bf16 %v526_v29, %v524_v28  ;;  %v619_v28 = vld [vmem:[#allocation7 + $0x198] sm:$0xff] }
 0x173   : > { %v3646_v38 = vpack.c.bf16 %v527_v34, %v525_v33  ;;  %1607 = vmatpush1.bf16.msra.mxu1 %v2554_v26  ;;  %v461_v39 = vpop.f32.mrb[8].mxu0  ;;  %1720 = vmatpush1.bf16.msra.mxu0 %v3639_v27  ;;  %v622_v26 = vld [vmem:[#allocation7 + $0x1b0] sm:$0xff]  ;;  %v623_v29 = vld [vmem:[#allocation7 + $0x1b8] sm:$0xff]  ;;  %v2586_v34 = vcombine.low %v610_v5, %v614_v8 }
 0x174   : > { %v462_v42 = vadd.f32 %v461_v39, %v3614_v55  ;;  %v463_v43 = vpop.f32.mrb[9].mxu0  ;;  %1608 = vmatprep.subr.bf16.mxu1 %v2563_v30  ;;  %1721 = vmatprep.subr.bf16.mxu0 %v3642_v31  ;;  %v2595_v39 = vcombine.high %v618_v23, %v622_v26  ;;  %v635_v8 = vld [vmem:[#allocation7 + $0x218] sm:$0xff] }
 0x175   : > { %v464_v47 = vadd.f32 %v463_v43, %v3618_v56  ;;  %v465_v50 = vpop.f32.mrb[10].mxu0  ;;  %1420 = vmatprep.mubr.bf16.mxu1 %v3646_v38  ;;  %1533 = vmatprep.mubr.bf16.mxu0 %v3646_v38 }
 0x176   : > { %v466_v59 = vadd.f32 %v465_v50, %v3614_v55  ;;  %v467_v60 = vpop.f32.mrb[11].mxu0  ;;  %1421 = vmatmul.mubr.bf16.gmra.mrb[4].mxu1 %v3644_v37  ;;  %1534 = vmatmul.mubr.bf16.gmra.mrb[36].mxu0 %v3644_v37  ;;  %v528_v1 = vmax.f32 %v462_v42, 0.0  ;;  %v626_v42 = vld [vmem:[#allocation7 + $0x1d0] sm:$0xff]  ;;  %v631_v50 = vld [vmem:[#allocation7 + $0x1f8] sm:$0xff] }
 0x177   : > { %v468_v61 = vadd.f32 %v467_v60, %v3618_v56  ;;  %1609 = vmatpush1.bf16.msra.mxu1 %v2562_v40  ;;  %1722 = vmatpush1.bf16.msra.mxu0 %v3649_v41  ;;  %v529_v6 = vmax.f32 %v464_v47, 0.0  ;;  %v3690_v40 = vcombine.high %v619_v28, %v623_v29  ;;  %v627_v47 = vld [vmem:[#allocation7 + $0x1d8] sm:$0xff]  ;;  %v3697_v60 = vcombine.low %v619_v28, %v623_v29 }
 0x178   : > { %v530_v2 = vmax.f32 %v466_v59, 0.0  ;;  %1610 = vmatprep.subr.bf16.mxu1 %v2571_v44  ;;  %1723 = vmatprep.subr.bf16.mxu0 %v3653_v45  ;;  %v2594_v59 = vcombine.low %v618_v23, %v622_v26  ;;  %v642_v26 = vld [vmem:[#allocation7 + $0x250] sm:$0xff] }
 0x179   : > { %v531_v7 = vmax.f32 %v468_v61, 0.0 }
 0x17a   : > { %v3668_v13 = vpack.c.bf16 %v530_v2, %v528_v1  ;;  %v2603_v1 = vcombine.high %v626_v42, %v630_v46  ;;  %v3701_v2 = vcombine.high %v627_v47, %v631_v50 }
 0x17b   : > { %v3670_v14 = vpack.c.bf16 %v531_v7, %v529_v6  ;;  %1611 = vmatpush1.bf16.msra.mxu1 %v2570_v62  ;;  %v471_v15 = vpop.f32.mrb[12].mxu0  ;;  %1724 = vmatpush1.bf16.msra.mxu0 %v3663_v63  ;;  %v638_v7 = vld [vmem:[#allocation7 + $0x230] sm:$0xff] }
 0x17c   : > { %v472_v19 = vadd.f32 %v471_v15, %v3614_v55  ;;  %v473_v20 = vpop.f32.mrb[13].mxu0  ;;  %1612 = vmatprep.subr.bf16.mxu1 %v2579_v3  ;;  %1725 = vmatprep.subr.bf16.mxu0 %v3666_v4  ;;  %v634_v3 = vld [vmem:[#allocation7 + $0x210] sm:$0xff] }
 0x17d   : > { %v474_v24 = vadd.f32 %v473_v20, %v3618_v56  ;;  %v475_v25 = vpop.f32.mrb[14].mxu0  ;;  %1430 = vmatprep.mubr.bf16.mxu1 %v3670_v14  ;;  %1543 = vmatprep.mubr.bf16.mxu0 %v3670_v14  ;;  %v3711_v20 = vcombine.low %v627_v47, %v631_v50  ;;  %v650_v50 = vld [vmem:[#allocation7 + $0x290] sm:$0xff] }
 0x17e   : > { %v476_v30 = vadd.f32 %v475_v25, %v3614_v55  ;;  %v477_v32 = vpop.f32.mrb[15].mxu0  ;;  %1431 = vmatmul.mubr.bf16.gmra.mrb[8].mxu1 %v3668_v13  ;;  %1544 = vmatmul.mubr.bf16.gmra.mrb[40].mxu0 %v3668_v13  ;;  %v532_v35 = vmax.f32 %v472_v19, 0.0  ;;  %v2602_v19 = vcombine.low %v626_v42, %v630_v46  ;;  %v3714_v25 = vcombine.high %v635_v8, %v639_v9 }
 0x17f   : > { %v478_v33 = vadd.f32 %v477_v32, %v3618_v56  ;;  %1613 = vmatpush1.bf16.msra.mxu1 %v2578_v17  ;;  %1726 = vmatpush1.bf16.msra.mxu0 %v3673_v18  ;;  %v533_v43 = vmax.f32 %v474_v24, 0.0  ;;  %v2611_v24 = vcombine.high %v634_v3, %v638_v7  ;;  %v643_v32 = vld [vmem:[#allocation7 + $0x258] sm:$0xff]  ;;  %v3721_v42 = vcombine.low %v635_v8, %v639_v9 }
 0x180   : > { %v534_v36 = vmax.f32 %v476_v30, 0.0  ;;  %1614 = vmatprep.subr.bf16.mxu1 %v2587_v21  ;;  %1727 = vmatprep.subr.bf16.mxu0 %v3677_v22  ;;  %v646_v30 = vld [vmem:[#allocation7 + $0x270] sm:$0xff] }
 0x181   : > { %v535_v44 = vmax.f32 %v478_v33, 0.0  ;;  %v647_v33 = vld [vmem:[#allocation7 + $0x278] sm:$0xff]  ;;  %v2619_v46 = vcombine.high %v642_v26, %v646_v30 }
 0x182   : > { %v3692_v53 = vpack.c.bf16 %v534_v36, %v532_v35  ;;  %v3725_v47 = vcombine.high %v643_v32, %v647_v33  ;;  %v3735_v8 = vcombine.low %v643_v32, %v647_v33 }
 0x183   : > { %v3694_v57 = vpack.c.bf16 %v535_v44, %v533_v43  ;;  %1615 = vmatpush1.bf16.msra.mxu1 %v2586_v34  ;;  %v481_v58 = vpop.f32.mrb[16].mxu0  ;;  %1728 = vmatpush1.bf16.msra.mxu0 %v3687_v0 }
 0x184   : > { %v482_v61 = vadd.f32 %v481_v58, %v3614_v55  ;;  %v483_v62 = vpop.f32.mrb[17].mxu0  ;;  %1616 = vmatprep.subr.bf16.mxu1 %v2595_v39  ;;  %1729 = vmatprep.subr.bf16.mxu0 %v3690_v40  ;;  %v2610_v39 = vcombine.low %v634_v3, %v638_v7  ;;  %v2618_v7 = vcombine.low %v642_v26, %v646_v30 }
 0x185   : > { %v484_v5 = vadd.f32 %v483_v62, %v3618_v56  ;;  %v485_v6 = vpop.f32.mrb[18].mxu0  ;;  %1440 = vmatprep.mubr.bf16.mxu1 %v3694_v57  ;;  %1553 = vmatprep.mubr.bf16.mxu0 %v3694_v57  ;;  %v651_v62 = vld [vmem:[#allocation7 + $0x298] sm:$0xff] }
 0x186   : > { %v486_v12 = vadd.f32 %v485_v6, %v3614_v55  ;;  %v487_v15 = vpop.f32.mrb[19].mxu0  ;;  %1441 = vmatmul.mubr.bf16.gmra.mrb[12].mxu1 %v3692_v53  ;;  %1554 = vmatmul.mubr.bf16.gmra.mrb[44].mxu0 %v3692_v53  ;;  %v536_v21 = vmax.f32 %v482_v61, 0.0  ;;  %v654_v61 = vld [vmem:[#allocation7 + $0x2b0] sm:$0xff] }
 0x187   : > { %v488_v17 = vadd.f32 %v487_v15, %v3618_v56  ;;  %1617 = vmatpush1.bf16.msra.mxu1 %v2594_v59  ;;  %1730 = vmatpush1.bf16.msra.mxu0 %v3697_v60  ;;  %v537_v28 = vmax.f32 %v484_v5, 0.0  ;;  %v2627_v15 = vcombine.high %v650_v50, %v654_v61  ;;  %v2626_v30 = vcombine.low %v650_v50, %v654_v61  ;;  %v670_v50 = vld [vmem:[#allocation7 + $0x330] sm:$0xff]  ;;  %v667_v61 = vld [vmem:[#allocation7 + $0x318] sm:$0xff] }
 0x188   : > { %v538_v23 = vmax.f32 %v486_v12, 0.0  ;;  %1618 = vmatprep.subr.bf16.mxu1 %v2603_v1  ;;  %1731 = vmatprep.subr.bf16.mxu0 %v3701_v2  ;;  %v655_v1 = vld [vmem:[#allocation7 + $0x2b8] sm:$0xff] }
 0x189   : > { %v539_v29 = vmax.f32 %v488_v17, 0.0  ;;  %v3738_v17 = vcombine.high %v651_v62, %v655_v1  ;;  %v3745_v32 = vcombine.low %v651_v62, %v655_v1  ;;  %v671_v62 = vld [vmem:[#allocation7 + $0x338] sm:$0xff] }
 0x18a   : > { %v3716_v34 = vpack.c.bf16 %v538_v23, %v536_v21 }
 0x18b   : > { %v3718_v35 = vpack.c.bf16 %v539_v29, %v537_v28  ;;  %1619 = vmatpush1.bf16.msra.mxu1 %v2602_v19  ;;  %v491_v36 = vpop.f32.mrb[20].mxu0  ;;  %1732 = vmatpush1.bf16.msra.mxu0 %v3711_v20  ;;  %v658_v19 = vld [vmem:[#allocation7 + $0x2d0] sm:$0xff]  ;;  %v659_v28 = vld [vmem:[#allocation7 + $0x2d8] sm:$0xff] }
 0x18c   : > { %v492_v43 = vadd.f32 %v491_v36, %v3614_v55  ;;  %v493_v44 = vpop.f32.mrb[21].mxu0  ;;  %1620 = vmatprep.subr.bf16.mxu1 %v2611_v24  ;;  %1733 = vmatprep.subr.bf16.mxu0 %v3714_v25  ;;  %v662_v24 = vld [vmem:[#allocation7 + $0x2f0] sm:$0xff]  ;;  %v663_v29 = vld [vmem:[#allocation7 + $0x2f8] sm:$0xff] }
 0x18d   : > { %v494_v58 = vadd.f32 %v493_v44, %v3618_v56  ;;  %v495_v59 = vpop.f32.mrb[22].mxu0  ;;  %1450 = vmatprep.mubr.bf16.mxu1 %v3718_v35  ;;  %1563 = vmatprep.mubr.bf16.mxu0 %v3718_v35  ;;  %v2635_v44 = vcombine.high %v658_v19, %v662_v24 }
 0x18e   : > { %v496_v3 = vadd.f32 %v495_v59, %v3614_v55  ;;  %v497_v5 = vpop.f32.mrb[23].mxu0  ;;  %1451 = vmatmul.mubr.bf16.gmra.mrb[16].mxu1 %v3716_v34  ;;  %1564 = vmatmul.mubr.bf16.gmra.mrb[48].mxu0 %v3716_v34  ;;  %v540_v9 = vmax.f32 %v492_v43, 0.0 }
 0x18f   : > { %v498_v6 = vadd.f32 %v497_v5, %v3618_v56  ;;  %1621 = vmatpush1.bf16.msra.mxu1 %v2610_v39  ;;  %1734 = vmatpush1.bf16.msra.mxu0 %v3721_v42  ;;  %v541_v21 = vmax.f32 %v494_v58, 0.0  ;;  %v666_v58 = vld [vmem:[#allocation7 + $0x310] sm:$0xff] }
 0x190   : > { %v542_v12 = vmax.f32 %v496_v3, 0.0  ;;  %1622 = vmatprep.subr.bf16.mxu1 %v2619_v46  ;;  %1735 = vmatprep.subr.bf16.mxu0 %v3725_v47  ;;  %v3749_v46 = vcombine.high %v659_v28, %v663_v29 }
 0x191   : > { %v543_v23 = vmax.f32 %v498_v6, 0.0 }
 0x192   : > { %v3740_v36 = vpack.c.bf16 %v542_v12, %v540_v9  ;;  %v3759_v9 = vcombine.low %v659_v28, %v663_v29  ;;  %v3769_v28 = vcombine.low %v667_v61, %v671_v62 }
 0x193   : > { %v3742_v39 = vpack.c.bf16 %v543_v23, %v541_v21  ;;  %1623 = vmatpush1.bf16.msra.mxu1 %v2618_v7  ;;  %v501_v26 = vpop.f32.mrb[24].mxu0  ;;  %1736 = vmatpush1.bf16.msra.mxu0 %v3735_v8  ;;  %v2634_v7 = vcombine.low %v658_v19, %v662_v24  ;;  %v2643_v21 = vcombine.high %v666_v58, %v670_v50 }
 0x194   : > { %v502_v33 = vadd.f32 %v501_v26, %v3614_v55  ;;  %v503_v43 = vpop.f32.mrb[25].mxu0  ;;  %1624 = vmatprep.subr.bf16.mxu1 %v2627_v15  ;;  %1737 = vmatprep.subr.bf16.mxu0 %v3738_v17  ;;  %4181 = vst [vmem:[#allocation13_spill] sm:$0xff] %v3759_v9  ;;  %v3762_v23 = vcombine.high %v667_v61, %v671_v62  ;;  %v674_v26 = vld [vmem:[#allocation7 + $0x350] sm:$0xff]  ;;  %4184 = vst [vmem:[#allocation16_spill] sm:$0xff] %v3769_v28  ;;  %v687_v61 = vld [vmem:[#allocation7 + $0x3b8] sm:$0xff] }
 0x195   : > { %v504_v59 = vadd.f32 %v503_v43, %v3618_v56  ;;  %v505_v3 = vpop.f32.mrb[26].mxu0  ;;  %1460 = vmatprep.mubr.bf16.mxu1 %v3742_v39  ;;  %1573 = vmatprep.mubr.bf16.mxu0 %v3742_v39  ;;  %v2642_v24 = vcombine.low %v666_v58, %v670_v50  ;;  %v686_v58 = vld [vmem:[#allocation7 + $0x3b0] sm:$0xff]  ;;  %v683_v50 = vld [vmem:[#allocation7 + $0x398] sm:$0xff] }
 0x196   : > { %v506_v1 = vadd.f32 %v505_v3, %v3614_v55  ;;  %v507_v5 = vpop.f32.mrb[27].mxu0  ;;  %1461 = vmatmul.mubr.bf16.gmra.mrb[20].mxu1 %v3740_v36  ;;  %1574 = vmatmul.mubr.bf16.gmra.mrb[52].mxu0 %v3740_v36  ;;  %v544_v12 = vmax.f32 %v502_v33, 0.0  ;;  %4182 = vst [vmem:[#allocation14_spill] sm:$0xff] %v3762_v23 }
 0x197   : > { %v508_v6 = vadd.f32 %v507_v5, %v3618_v56  ;;  %1625 = vmatpush1.bf16.msra.mxu1 %v2626_v30  ;;  %1738 = vmatpush1.bf16.msra.mxu0 %v3745_v32  ;;  %v545_v43 = vmax.f32 %v504_v59, 0.0  ;;  %v679_v5 = vld [vmem:[#allocation7 + $0x378] sm:$0xff] }
 0x198   : > { %v546_v15 = vmax.f32 %v506_v1, 0.0  ;;  %1626 = vmatprep.subr.bf16.mxu1 %v2635_v44  ;;  %1739 = vmatprep.subr.bf16.mxu0 %v3749_v46  ;;  %v2651_v44 = vcombine.high %v674_v26, %v678_v54  ;;  %v3773_v59 = vcombine.high %v675_v52, %v679_v5  ;;  %v682_v1 = vld [vmem:[#allocation7 + $0x390] sm:$0xff] }
 0x199   : > { %v547_v3 = vmax.f32 %v508_v6, 0.0 }
 0x19a   : > { %v3764_v30 = vpack.c.bf16 %v546_v15, %v544_v12 }
 0x19b   : > { %v3766_v51 = vpack.c.bf16 %v547_v3, %v545_v43  ;;  %1627 = vmatpush1.bf16.msra.mxu1 %v2634_v7  ;;  %v511_v19 = vpop.f32.mrb[28].mxu0  ;;  %1740 = vmatpush1.bf16.msra.mxu0 %v3759_v9  ;;  %v3783_v43 = vcombine.low %v675_v52, %v679_v5  ;;  %v690_v9 = vld [vmem:[#allocation7 + $0x3d0] sm:$0xff]  ;;  %v2658_v52 = vcombine.low %v682_v1, %v686_v58 }
 0x19c   : > { %4183 = vst [vmem:[#allocation15_spill] sm:$0xff] %v3764_v30  ;;  %v512_v29 = vadd.f32 %v511_v19, %v3614_v55  ;;  %v513_v33 = vpop.f32.mrb[29].mxu0  ;;  %1628 = vmatprep.subr.bf16.mxu1 %v2643_v21  ;;  %1741 = vmatprep.subr.bf16.mxu0 %v3762_v23  ;;  %v2650_v21 = vcombine.low %v674_v26, %v678_v54 }
 0x19d   : > { %v514_v6 = vadd.f32 %v513_v33, %v3618_v56  ;;  %v515_v12 = vpop.f32.mrb[30].mxu0  ;;  %1470 = vmatprep.mubr.bf16.mxu1 %v3766_v51  ;;  %1583 = vmatprep.mubr.bf16.mxu0 %v3766_v51  ;;  %v2659_v33 = vcombine.high %v682_v1, %v686_v58  ;;  %v3793_v54 = vcombine.low %v683_v50, %v687_v61 }
 0x19e   : > { %v516_v62 = vadd.f32 %v515_v12, %v3614_v55  ;;  %v517_v7 = vpop.f32.mrb[31].mxu0  ;;  %1471 = vmatmul.mubr.bf16.gmra.mrb[24].mxu1 %v3764_v30  ;;  %1584 = vmatmul.mubr.bf16.gmra.mrb[56].mxu0 %v3764_v30  ;;  %v548_v3 = vmax.f32 %v512_v29, 0.0  ;;  %v3786_v55 = vcombine.high %v683_v50, %v687_v61 }
 0x19f   : > { %v518_v15 = vadd.f32 %v517_v7, %v3618_v56  ;;  %1629 = vmatpush1.bf16.msra.mxu1 %v2642_v24  ;;  %1742 = vmatpush1.bf16.msra.mxu0 %v3769_v28  ;;  %v549_v12 = vmax.f32 %v514_v6, 0.0  ;;  %v694_v56 = vld [vmem:[#allocation7 + $0x3f0] sm:$0xff]  ;;  %v691_v24 = vld [vmem:[#allocation7 + $0x3d8] sm:$0xff] }
 0x1a0   : > { %v550_v19 = vmax.f32 %v516_v62, 0.0  ;;  %1630 = vmatprep.subr.bf16.mxu1 %v2651_v44  ;;  %1743 = vmatprep.subr.bf16.mxu0 %v3773_v59  ;;  %v695_v7 = vld [vmem:[#allocation7 + $0x3f8] sm:$0xff]  ;;  %v2667_v26 = vcombine.high %v690_v9, %v694_v56 }
 0x1a1   : > { %v551_v23 = vmax.f32 %v518_v15, 0.0  ;;  %v3798_v5 = vcombine.high %v691_v24, %v695_v7  ;;  %v2668_v29 = vcombine.low %v691_v24, %v695_v7 }
 0x1a2   : > { %v3788_v30 = vpack.c.bf16 %v550_v19, %v548_v3 }
 0x1a3   : > { %v3790_v28 = vpack.c.bf16 %v551_v23, %v549_v12  ;;  %1631 = vmatpush1.bf16.msra.mxu1 %v2650_v21  ;;  %1744 = vmatpush1.bf16.msra.mxu0 %v3783_v43  ;;  %v2666_v23 = vcombine.low %v690_v9, %v694_v56 }
 0x1a4   : > { %1632 = vmatprep.subr.bf16.mxu1 %v2659_v33  ;;  %1745 = vmatprep.subr.bf16.mxu0 %v3786_v55 }
 0x1a5   : > { %1480 = vmatprep.mubr.bf16.mxu1 %v3790_v28  ;;  %1593 = vmatprep.mubr.bf16.mxu0 %v3790_v28 }
 0x1a6   : > { %1481 = vmatmul.mubr.bf16.gmra.mrb[28].mxu1 %v3788_v30  ;;  %1594 = vmatmul.mubr.bf16.gmra.mrb[60].mxu0 %v3788_v30 }
 0x1a7   : > { %1633 = vmatpush1.bf16.msra.mxu1 %v2658_v52  ;;  %1636 = vmatprep.mubr.bf16.mxu1 %v3626_v11 }
 0x1a8   : > { %1746 = vmatpush1.bf16.msra.mxu0 %v3793_v54  ;;  %1749 = vmatprep.mubr.bf16.mxu0 %v3626_v11  ;;  %v4188_v11 = vld [vmem:[#allocation16_spill] sm:$0xff] }
 0x1a9   : > { %1634 = vmatprep.subr.bf16.mxu1 %v2667_v26  ;;  %1747 = vmatprep.subr.bf16.mxu0 %v3798_v5 }
 0x1ab   : > { %1635 = vmatpush1.bf16.msra.mxu1 %v2666_v23 }
 0x1ac   : > { %1748 = vmatpush1.bf16.msra.mxu0 %v2668_v29  ;;  %2807 = vmatprep.subr.bf16.mxu1 %v3602_v49  ;;  %v4186_v49 = vld [vmem:[#allocation14_spill] sm:$0xff] }
 0x1ae   : > { %1637 = vmatmul.mubr.bf16.vlgmr.msra.gmra.mrb[32].mxu1 %v3624_v10 }
 0x1af   : > { %2823 = vmatpush1.bf16.msra.mxu1 %v3600_v48  ;;  %1750 = vmatmul.mubr.bf16.vlgmr.msra.gmra.mrb[64].mxu0 %v3624_v10  ;;  %v4185_v48 = vld [vmem:[#allocation13_spill] sm:$0xff]  ;;  %v4187_v10 = vld [vmem:[#allocation15_spill] sm:$0xff] }
 0x1b0   : > { %1646 = vmatprep.mubr.bf16.mxu1 %v3646_v38  ;;  %1759 = vmatprep.mubr.bf16.mxu0 %v3646_v38 }
 0x1b1   : > { %2808 = vmatprep.subr.bf16.mxu1 %v3629_v16  ;;  %v4189_v16 = vld [vmem:[#allocation12_spill] sm:$0xff] }
 0x1b3   : > { %2824 = vmatpush1.bf16.msra.mxu1 %v3639_v27  ;;  %v708_v27 = vsub.s32 2, %v4189_v16 }
 0x1b4   : > { %2809 = vmatprep.subr.bf16.mxu1 %v3642_v31  ;;  %v3871_v31 = vld [vmem:[%s4155_s4] sm:$0xff] }
 0x1b6   : > { %1647 = vmatmul.mubr.bf16.gmra.mrb[36].mxu1 %v3644_v37 }
 0x1b7   : > { %2825 = vmatpush1.bf16.msra.mxu1 %v3649_v41  ;;  %1760 = vmatmul.mubr.bf16.gmra.mrb[68].mxu0 %v3644_v37  ;;  %v712_v37 = vsub.s32 3, %v4189_v16  ;;  %v3880_v41 = vrot.slane %v3871_v31, %v708_v27 }
 0x1b8   : > { %1656 = vmatprep.mubr.bf16.mxu1 %v3670_v14  ;;  %1769 = vmatprep.mubr.bf16.mxu0 %v3670_v14 }
 0x1b9   : > { %2810 = vmatprep.subr.bf16.mxu1 %v3653_v45  ;;  %v4191_v45 = vsub.s32 1, %v4189_v16 }
 0x1bb   : > { %2826 = vmatpush1.bf16.msra.mxu1 %v3663_v63  ;;  %v3885_v63 = vrot.slane %v3871_v31, %v4191_v45 }
 0x1bc   : > { %2811 = vmatprep.subr.bf16.mxu1 %v3666_v4  ;;  %v3888_v4 = vrot.slane %v3871_v31, %v712_v37 }
 0x1be   : > { %1657 = vmatmul.mubr.bf16.gmra.mrb[40].mxu1 %v3668_v13 }
 0x1bf   : > { %2827 = vmatpush1.bf16.msra.mxu1 %v3673_v18  ;;  %1770 = vmatmul.mubr.bf16.gmra.mrb[72].mxu0 %v3668_v13 }
 0x1c0   : > { %1666 = vmatprep.mubr.bf16.mxu1 %v3694_v57  ;;  %1779 = vmatprep.mubr.bf16.mxu0 %v3694_v57 }
 0x1c1   : > { %2812 = vmatprep.subr.bf16.mxu1 %v3677_v22 }
 0x1c3   : > { %2828 = vmatpush1.bf16.msra.mxu1 %v3687_v0 }
 0x1c4   : > { %2813 = vmatprep.subr.bf16.mxu1 %v3690_v40 }
 0x1c6   : > { %1667 = vmatmul.mubr.bf16.gmra.mrb[44].mxu1 %v3692_v53 }
 0x1c7   : > { %2829 = vmatpush1.bf16.msra.mxu1 %v3697_v60  ;;  %1780 = vmatmul.mubr.bf16.gmra.mrb[76].mxu0 %v3692_v53 }
 0x1c8   : > { %1676 = vmatprep.mubr.bf16.mxu1 %v3718_v35  ;;  %1789 = vmatprep.mubr.bf16.mxu0 %v3718_v35 }
 0x1c9   : > { %2814 = vmatprep.subr.bf16.mxu1 %v3701_v2 }
 0x1cb   : > { %2830 = vmatpush1.bf16.msra.mxu1 %v3711_v20 }
 0x1cc   : > { %2815 = vmatprep.subr.bf16.mxu1 %v3714_v25 }
 0x1ce   : > { %1677 = vmatmul.mubr.bf16.gmra.mrb[48].mxu1 %v3716_v34 }
 0x1cf   : > { %2831 = vmatpush1.bf16.msra.mxu1 %v3721_v42  ;;  %1790 = vmatmul.mubr.bf16.gmra.mrb[80].mxu0 %v3716_v34 }
 0x1d0   : > { %1686 = vmatprep.mubr.bf16.mxu1 %v3742_v39  ;;  %1799 = vmatprep.mubr.bf16.mxu0 %v3742_v39 }
 0x1d1   : > { %2816 = vmatprep.subr.bf16.mxu1 %v3725_v47 }
 0x1d3   : > { %2832 = vmatpush1.bf16.msra.mxu1 %v3735_v8 }
 0x1d4   : > { %2817 = vmatprep.subr.bf16.mxu1 %v3738_v17 }
 0x1d6   : > { %1687 = vmatmul.mubr.bf16.gmra.mrb[52].mxu1 %v3740_v36 }
 0x1d7   : > { %2833 = vmatpush1.bf16.msra.mxu1 %v3745_v32  ;;  %1800 = vmatmul.mubr.bf16.gmra.mrb[84].mxu0 %v3740_v36 }
 0x1d8   : > { %1696 = vmatprep.mubr.bf16.mxu1 %v3766_v51  ;;  %2818 = vmatprep.subr.bf16.mxu1 %v3749_v46 }
 0x1db   : > { %2834 = vmatpush1.bf16.msra.mxu1 %v4185_v48 }
 0x1dc   : > { %2819 = vmatprep.subr.bf16.mxu1 %v4186_v49 }
 0x1de   : > { %1697 = vmatmul.mubr.bf16.gmra.mrb[56].mxu1 %v4187_v10 }
 0x1df   : > { %2835 = vmatpush1.bf16.msra.mxu1 %v4188_v11  ;;  %1706 = vmatprep.mubr.bf16.mxu1 %v3790_v28 }
 0x1e0   : > { %2820 = vmatprep.subr.bf16.mxu1 %v3773_v59 }
 0x1e3   : > { %2836 = vmatpush1.bf16.msra.mxu1 %v3783_v43 }
 0x1e4   : > { %2821 = vmatprep.subr.bf16.mxu1 %v3786_v55 }
 0x1e6   : > { %1707 = vmatmul.mubr.bf16.gmra.mrb[60].mxu1 %v3788_v30 }
 0x1e7   : > { %2837 = vmatpush1.bf16.msra.mxu1 %v3793_v54  ;;  %1809 = vmatprep.mubr.bf16.mxu1 %v3766_v51  ;;  %v4190_v51 = vsub.s32 0, %v4189_v16 }
 0x1e8   : > { %2822 = vmatprep.subr.bf16.mxu1 %v3798_v5 }
 0x1e9   : > { %v3877_v38 = vrot.slane %v3871_v31, %v4190_v51 }
 0x1eb   : > { %2838 = vmatpush1.bf16.msra.mxu1 %v2668_v29 }
 0x1ee   : > { %1810 = vmatmul.mubr.bf16.vlgmr.msra.gmra.mrb[64].mxu1 %v4187_v10 }
 0x1ef   : > { %1819 = vmatprep.mubr.bf16.mxu1 %v3790_v28 }
 0x1f6   : > { %1820 = vmatmul.mubr.bf16.gmra.mrb[68].mxu1 %v3788_v30 }
 0x241   : > { %v1412_v13 = vpop.f32.mrb[0].mxu1  ;;  %v1525_v14 = vpop.f32.mrb[32].mxu0 }
 0x242   : > { %v1413_v18 = vadd.f32 %v1412_v13, %v3877_v38  ;;  %v1526_v22 = vadd.f32 %v1525_v14, %v3880_v41  ;;  %v1414_v0 = vpop.f32.mrb[1].mxu1  ;;  %v1527_v40 = vpop.f32.mrb[33].mxu0 }
 0x243   : > { %v1415_v53 = vadd.f32 %v1414_v0, %v3885_v63  ;;  %v1528_v57 = vadd.f32 %v1527_v40, %v3888_v4  ;;  %v1416_v60 = vpop.f32.mrb[2].mxu1  ;;  %v1529_v2 = vpop.f32.mrb[34].mxu0 }
 0x244   : > { %2937 = vtanh.f32 %v1413_v18  ;;  %v1417_v20 = vadd.f32 %v1416_v60, %v3877_v38  ;;  %v1418_v25 = vpop.f32.mrb[3].mxu1  ;;  %v1531_v34 = vpop.f32.mrb[35].mxu0  ;;  %v1530_v35 = vadd.f32 %v1529_v2, %v3880_v41 }
 0x245   : > { %2939 = vtanh.f32 %v1526_v22  ;;  %v1419_v42 = vadd.f32 %v1418_v25, %v3885_v63  ;;  %v1532_v47 = vadd.f32 %v1531_v34, %v3888_v4 }
 0x246   : > { %2941 = vtanh.f32 %v1415_v53 }
 0x247   : > { %2943 = vtanh.f32 %v1528_v57 }
 0x248   : > { %2945 = vtanh.f32 %v1417_v20 }
 0x249   : > { %2947 = vtanh.f32 %v1530_v35  ;;  %v1422_v8 = vpop.f32.mrb[4].mxu1  ;;  %v1535_v17 = vpop.f32.mrb[36].mxu0 }
 0x24a   : > { %2949 = vtanh.f32 %v1419_v42  ;;  %v1423_v36 = vadd.f32 %v1422_v8, %v3877_v38  ;;  %v1536_v39 = vadd.f32 %v1535_v17, %v3880_v41  ;;  %v1424_v32 = vpop.f32.mrb[5].mxu1  ;;  %v1537_v46 = vpop.f32.mrb[37].mxu0 }
 0x24b   : > { %2951 = vtanh.f32 %v1532_v47  ;;  %v1425_v9 = vadd.f32 %v1424_v32, %v3885_v63  ;;  %v1538_v30 = vadd.f32 %v1537_v46, %v3888_v4  ;;  %v1426_v28 = vpop.f32.mrb[6].mxu1  ;;  %v1539_v44 = vpop.f32.mrb[38].mxu0 }
 0x24c   : > { %2953 = vtanh.f32 %v1423_v36  ;;  %v1427_v59 = vadd.f32 %v1426_v28, %v3877_v38  ;;  %v1428_v1 = vpop.f32.mrb[7].mxu1  ;;  %v1541_v6 = vpop.f32.mrb[39].mxu0  ;;  %v1540_v58 = vadd.f32 %v1539_v44, %v3880_v41 }
 0x24d   : > { %2955 = vtanh.f32 %v1536_v39  ;;  %v1429_v61 = vadd.f32 %v1428_v1, %v3885_v63  ;;  %v1542_v15 = vadd.f32 %v1541_v6, %v3888_v4 }
 0x24e   : > { %v2938_v50 = vpop.eup %2937  ;;  %2957 = vtanh.f32 %v1425_v9 }
 0x24f   : > { %v2940_v62 = vpop.eup %2939  ;;  %2959 = vtanh.f32 %v1538_v30 }
 0x250   : > { %v2942_v21 = vpop.eup %2941  ;;  %2961 = vtanh.f32 %v1427_v59 }
 0x251   : > { %v2944_v43 = vpop.eup %2943  ;;  %v2741_v3 = vpack.c.bf16 %v2942_v21, %v2938_v50  ;;  %2963 = vtanh.f32 %v1540_v58  ;;  %v1432_v19 = vpop.f32.mrb[8].mxu1 }
 0x252   : > { %v1545_v33 = vpop.f32.mrb[40].mxu0  ;;  %v2946_v55 = vpop.eup %2945  ;;  %v2742_v12 = vpack.c.bf16 %v2944_v43, %v2940_v62  ;;  %2965 = vtanh.f32 %v1429_v61  ;;  %v1433_v56 = vadd.f32 %v1432_v19, %v3877_v38 }
 0x253   : > { %v1546_v24 = vadd.f32 %v1545_v33, %v3880_v41  ;;  %v1434_v7 = vpop.f32.mrb[9].mxu1  ;;  %v1547_v52 = vpop.f32.mrb[41].mxu0  ;;  %2342 = vst [vmem:[%s3909_s13] sm:$0xff] %v2741_v3  ;;  %2967 = vtanh.f32 %v1542_v15 }
 0x254   : > { %v2948_v54 = vpop.eup %2947  ;;  %v1435_v26 = vadd.f32 %v1434_v7, %v3885_v63  ;;  %v1548_v5 = vadd.f32 %v1547_v52, %v3888_v4  ;;  %v1436_v23 = vpop.f32.mrb[10].mxu1  ;;  %2343 = vst [vmem:[%s3909_s13 + $0x8] sm:$0xff] %v2742_v12  ;;  %2969 = vtanh.f32 %v1433_v56 }
 0x255   : > { %v1549_v29 = vpop.f32.mrb[42].mxu0  ;;  %v2950_v48 = vpop.eup %2949  ;;  %v1437_v49 = vadd.f32 %v1436_v23, %v3877_v38  ;;  %2971 = vtanh.f32 %v1546_v24 }
 0x256   : > { %v1438_v10 = vpop.f32.mrb[11].mxu1  ;;  %v1551_v11 = vpop.f32.mrb[43].mxu0  ;;  %v2745_v37 = vpack.c.bf16 %v2950_v48, %v2946_v55  ;;  %v1550_v51 = vadd.f32 %v1549_v29, %v3880_v41  ;;  %2973 = vtanh.f32 %v1435_v26 }
 0x257   : > { %v2952_v27 = vpop.eup %2951  ;;  %v1439_v14 = vadd.f32 %v1438_v10, %v3885_v63  ;;  %2975 = vtanh.f32 %v1548_v5  ;;  %v1552_v22 = vadd.f32 %v1551_v11, %v3888_v4 }
 0x258   : > { %v2954_v45 = vpop.eup %2953  ;;  %v2746_v13 = vpack.c.bf16 %v2952_v27, %v2948_v54  ;;  %2346 = vst [vmem:[%s3909_s13 + $0x20] sm:$0xff] %v2745_v37  ;;  %2977 = vtanh.f32 %v1437_v49 }
 0x259   : > { %v2956_v18 = vpop.eup %2955  ;;  %2979 = vtanh.f32 %v1550_v51  ;;  %v1442_v57 = vpop.f32.mrb[12].mxu1 }
 0x25a   : > { %v2958_v0 = vpop.eup %2957  ;;  %2347 = vst [vmem:[%s3909_s13 + $0x28] sm:$0xff] %v2746_v13  ;;  %v1555_v60 = vpop.f32.mrb[44].mxu0  ;;  %2981 = vtanh.f32 %v1439_v14  ;;  %v1443_v25 = vadd.f32 %v1442_v57, %v3877_v38 }
 0x25b   : > { %v2960_v40 = vpop.eup %2959  ;;  %v2749_v53 = vpack.c.bf16 %v2958_v0, %v2954_v45  ;;  %v1556_v34 = vadd.f32 %v1555_v60, %v3880_v41  ;;  %v1444_v35 = vpop.f32.mrb[13].mxu1  ;;  %2983 = vtanh.f32 %v1552_v22 }
 0x25c   : > { %v2962_v2 = vpop.eup %2961  ;;  %v2750_v20 = vpack.c.bf16 %v2960_v40, %v2956_v18  ;;  %v1557_v42 = vpop.f32.mrb[45].mxu0  ;;  %v1445_v8 = vadd.f32 %v1444_v35, %v3885_v63  ;;  %2985 = vtanh.f32 %v1443_v25 }
 0x25d   : > { %v2964_v47 = vpop.eup %2963  ;;  %2350 = vst [vmem:[%s3909_s13 + $0x40] sm:$0xff] %v2749_v53  ;;  %v1558_v17 = vadd.f32 %v1557_v42, %v3888_v4  ;;  %v1446_v36 = vpop.f32.mrb[14].mxu1  ;;  %2987 = vtanh.f32 %v1556_v34 }
 0x25e   : > { %v1559_v39 = vpop.f32.mrb[46].mxu0  ;;  %v2966_v32 = vpop.eup %2965  ;;  %2351 = vst [vmem:[%s3909_s13 + $0x48] sm:$0xff] %v2750_v20  ;;  %v1447_v46 = vadd.f32 %v1446_v36, %v3877_v38  ;;  %2989 = vtanh.f32 %v1445_v8 }
 0x25f   : > { %v1448_v9 = vpop.f32.mrb[15].mxu1  ;;  %v1561_v30 = vpop.f32.mrb[47].mxu0  ;;  %v2753_v44 = vpack.c.bf16 %v2966_v32, %v2962_v2  ;;  %v1560_v59 = vadd.f32 %v1559_v39, %v3880_v41  ;;  %2991 = vtanh.f32 %v1558_v17 }
 0x260   : > { %v2968_v28 = vpop.eup %2967  ;;  %v1449_v58 = vadd.f32 %v1448_v9, %v3885_v63  ;;  %v1562_v61 = vadd.f32 %v1561_v30, %v3888_v4  ;;  %2993 = vtanh.f32 %v1447_v46 }
 0x261   : > { %v2970_v1 = vpop.eup %2969  ;;  %v2754_v6 = vpack.c.bf16 %v2968_v28, %v2964_v47  ;;  %2354 = vst [vmem:[%s3909_s13 + $0x60] sm:$0xff] %v2753_v44  ;;  %2995 = vtanh.f32 %v1560_v59  ;;  %v1452_v43 = vpop.f32.mrb[16].mxu1 }
 0x262   : > { %v2972_v50 = vpop.eup %2971  ;;  %v1565_v3 = vpop.f32.mrb[48].mxu0  ;;  %2997 = vtanh.f32 %v1449_v58  ;;  %v1453_v55 = vadd.f32 %v1452_v43, %v3877_v38 }
 0x263   : > { %v2974_v62 = vpop.eup %2973  ;;  %2355 = vst [vmem:[%s3909_s13 + $0x68] sm:$0xff] %v2754_v6  ;;  %v1566_v12 = vadd.f32 %v1565_v3, %v3880_v41  ;;  %v1454_v56 = vpop.f32.mrb[17].mxu1  ;;  %2999 = vtanh.f32 %v1562_v61 }
 0x264   : > { %v2976_v15 = vpop.eup %2975  ;;  %v2757_v21 = vpack.c.bf16 %v2974_v62, %v2970_v1  ;;  %v1567_v24 = vpop.f32.mrb[49].mxu0  ;;  %v1455_v52 = vadd.f32 %v1454_v56, %v3885_v63  ;;  %3001 = vtanh.f32 %v1453_v55 }
 0x265   : > { %v2978_v19 = vpop.eup %2977  ;;  %v2758_v33 = vpack.c.bf16 %v2976_v15, %v2972_v50  ;;  %v1568_v54 = vadd.f32 %v1567_v24, %v3888_v4  ;;  %v1456_v26 = vpop.f32.mrb[18].mxu1  ;;  %3003 = vtanh.f32 %v1566_v12 }
 0x266   : > { %v2980_v7 = vpop.eup %2979  ;;  %2358 = vst [vmem:[%s3909_s13 + $0x80] sm:$0xff] %v2757_v21  ;;  %v1569_v5 = vpop.f32.mrb[50].mxu0  ;;  %v1457_v29 = vadd.f32 %v1456_v26, %v3877_v38  ;;  %3005 = vtanh.f32 %v1455_v52 }
 0x267   : > { %v2982_v23 = vpop.eup %2981  ;;  %2359 = vst [vmem:[%s3909_s13 + $0x88] sm:$0xff] %v2758_v33  ;;  %v1458_v48 = vpop.f32.mrb[19].mxu1  ;;  %v1570_v27 = vadd.f32 %v1569_v5, %v3880_v41  ;;  %3007 = vtanh.f32 %v1568_v54 }
 0x268   : > { %v1571_v49 = vpop.f32.mrb[51].mxu0  ;;  %v2984_v10 = vpop.eup %2983  ;;  %v2761_v11 = vpack.c.bf16 %v2982_v23, %v2978_v19  ;;  %v1459_v45 = vadd.f32 %v1458_v48, %v3885_v63  ;;  %3009 = vtanh.f32 %v1457_v29 }
 0x269   : > { %v2986_v37 = vpop.eup %2985  ;;  %v2762_v51 = vpack.c.bf16 %v2984_v10, %v2980_v7  ;;  %v1572_v14 = vadd.f32 %v1571_v49, %v3888_v4  ;;  %3011 = vtanh.f32 %v1570_v27  ;;  %v1462_v40 = vpop.f32.mrb[20].mxu1 }
 0x26a   : > { %v2988_v13 = vpop.eup %2987  ;;  %2362 = vst [vmem:[%s3909_s13 + $0xa0] sm:$0xff] %v2761_v11  ;;  %v1575_v53 = vpop.f32.mrb[52].mxu0  ;;  %3013 = vtanh.f32 %v1459_v45  ;;  %v1463_v2 = vadd.f32 %v1462_v40, %v3877_v38  ;;  %v716_v40 = vsub.s32 4, %v4189_v16 }
 0x26b   : > { %v2990_v18 = vpop.eup %2989  ;;  %2363 = vst [vmem:[%s3909_s13 + $0xa8] sm:$0xff] %v2762_v51  ;;  %v1576_v20 = vadd.f32 %v1575_v53, %v3880_v41  ;;  %v1464_v25 = vpop.f32.mrb[21].mxu1  ;;  %3015 = vtanh.f32 %v1572_v14  ;;  %v724_v53 = vsub.s32 6, %v4189_v16 }
 0x26c   : > { %v2992_v22 = vpop.eup %2991  ;;  %v2765_v0 = vpack.c.bf16 %v2990_v18, %v2986_v37  ;;  %v1577_v34 = vpop.f32.mrb[53].mxu0  ;;  %v1465_v42 = vadd.f32 %v1464_v25, %v3885_v63  ;;  %3017 = vtanh.f32 %v1463_v2 }
 0x26d   : > { %v2994_v57 = vpop.eup %2993  ;;  %v2766_v60 = vpack.c.bf16 %v2992_v22, %v2988_v13  ;;  %v1578_v47 = vadd.f32 %v1577_v34, %v3888_v4  ;;  %v1466_v8 = vpop.f32.mrb[22].mxu1  ;;  %3019 = vtanh.f32 %v1576_v20 }
 0x26e   : > { %v2996_v35 = vpop.eup %2995  ;;  %2366 = vst [vmem:[%s3909_s13 + $0xc0] sm:$0xff] %v2765_v0  ;;  %v1579_v17 = vpop.f32.mrb[54].mxu0  ;;  %v1467_v39 = vadd.f32 %v1466_v8, %v3877_v38  ;;  %3021 = vtanh.f32 %v1465_v42 }
 0x26f   : > { %v2998_v36 = vpop.eup %2997  ;;  %2367 = vst [vmem:[%s3909_s13 + $0xc8] sm:$0xff] %v2766_v60  ;;  %v1468_v32 = vpop.f32.mrb[23].mxu1  ;;  %v1580_v28 = vadd.f32 %v1579_v17, %v3880_v41  ;;  %3023 = vtanh.f32 %v1578_v47 }
 0x270   : > { %v1581_v46 = vpop.f32.mrb[55].mxu0  ;;  %v3000_v9 = vpop.eup %2999  ;;  %v2769_v30 = vpack.c.bf16 %v2998_v36, %v2994_v57  ;;  %v1469_v1 = vadd.f32 %v1468_v32, %v3885_v63  ;;  %3025 = vtanh.f32 %v1467_v39  ;;  %v720_v36 = vsub.s32 5, %v4189_v16 }
 0x271   : > { %v3002_v44 = vpop.eup %3001  ;;  %v2770_v59 = vpack.c.bf16 %v3000_v9, %v2996_v35  ;;  %v1582_v58 = vadd.f32 %v1581_v46, %v3888_v4  ;;  %3027 = vtanh.f32 %v1580_v28  ;;  %v1472_v15 = vpop.f32.mrb[24].mxu1 }
 0x272   : > { %v3004_v6 = vpop.eup %3003  ;;  %2370 = vst [vmem:[%s3909_s13 + $0xe0] sm:$0xff] %v2769_v30  ;;  %v1585_v21 = vpop.f32.mrb[56].mxu0  ;;  %3029 = vtanh.f32 %v1469_v1  ;;  %v1473_v19 = vadd.f32 %v1472_v15, %v3877_v38  ;;  %v728_v30 = vsub.s32 7, %v4189_v16  ;;  %v3988_v16 = vrot.slane %v3871_v31, %v724_v53 }
 0x273   : > { %v3006_v50 = vpop.eup %3005  ;;  %2371 = vst [vmem:[%s3909_s13 + $0xe8] sm:$0xff] %v2770_v59  ;;  %v1586_v33 = vadd.f32 %v1585_v21, %v3880_v41  ;;  %v1474_v55 = vpop.f32.mrb[25].mxu1  ;;  %3031 = vtanh.f32 %v1582_v58 }
 0x274   : > { %v3008_v61 = vpop.eup %3007  ;;  %v2773_v62 = vpack.c.bf16 %v3006_v50, %v3002_v44  ;;  %v1587_v12 = vpop.f32.mrb[57].mxu0  ;;  %v1475_v24 = vadd.f32 %v1474_v55, %v3885_v63  ;;  %3033 = vtanh.f32 %v1473_v19  ;;  %v3983_v50 = vrot.slane %v3871_v31, %v716_v40 }
 0x275   : > { %v3010_v43 = vpop.eup %3009  ;;  %v2774_v3 = vpack.c.bf16 %v3008_v61, %v3004_v6  ;;  %v1588_v7 = vadd.f32 %v1587_v12, %v3888_v4  ;;  %v1476_v52 = vpop.f32.mrb[26].mxu1  ;;  %3035 = vtanh.f32 %v1586_v33 }
 0x276   : > { %v3012_v56 = vpop.eup %3011  ;;  %2374 = vst [vmem:[%s3909_s13 + $0x100] sm:$0xff] %v2773_v62  ;;  %v1589_v54 = vpop.f32.mrb[58].mxu0  ;;  %v1477_v5 = vadd.f32 %v1476_v52, %v3877_v38  ;;  %3037 = vtanh.f32 %v1475_v24  ;;  %v3991_v62 = vrot.slane %v3871_v31, %v720_v36 }
 0x277   : > { %v3014_v26 = vpop.eup %3013  ;;  %2375 = vst [vmem:[%s3909_s13 + $0x108] sm:$0xff] %v2774_v3  ;;  %v1478_v23 = vpop.f32.mrb[27].mxu1  ;;  %v1590_v10 = vadd.f32 %v1589_v54, %v3880_v41  ;;  %3039 = vtanh.f32 %v1588_v7 }
 0x278   : > { %v1591_v29 = vpop.f32.mrb[59].mxu0  ;;  %v3016_v48 = vpop.eup %3015  ;;  %v2777_v49 = vpack.c.bf16 %v3014_v26, %v3010_v43  ;;  %v1479_v37 = vadd.f32 %v1478_v23, %v3885_v63  ;;  %3041 = vtanh.f32 %v1477_v5 }
 0x279   : > { %v3018_v11 = vpop.eup %3017  ;;  %v2778_v27 = vpack.c.bf16 %v3016_v48, %v3012_v56  ;;  %v1592_v45 = vadd.f32 %v1591_v29, %v3888_v4  ;;  %3043 = vtanh.f32 %v1590_v10  ;;  %v1482_v22 = vpop.f32.mrb[28].mxu1 }
 0x27a   : > { %v3020_v51 = vpop.eup %3019  ;;  %2378 = vst [vmem:[%s3909_s13 + $0x120] sm:$0xff] %v2777_v49  ;;  %v1595_v0 = vpop.f32.mrb[60].mxu0  ;;  %3045 = vtanh.f32 %v1479_v37  ;;  %v1483_v2 = vadd.f32 %v1482_v22, %v3877_v38 }
 0x27b   : > { %v3022_v13 = vpop.eup %3021  ;;  %2379 = vst [vmem:[%s3909_s13 + $0x128] sm:$0xff] %v2778_v27  ;;  %v1596_v20 = vadd.f32 %v1595_v0, %v3880_v41  ;;  %v1484_v25 = vpop.f32.mrb[29].mxu1  ;;  %3047 = vtanh.f32 %v1592_v45 }
 0x27c   : > { %v3024_v14 = vpop.eup %3023  ;;  %v2781_v18 = vpack.c.bf16 %v3022_v13, %v3018_v11  ;;  %v1597_v34 = vpop.f32.mrb[61].mxu0  ;;  %v1485_v42 = vadd.f32 %v1484_v25, %v3885_v63  ;;  %3049 = vtanh.f32 %v1483_v2 }
 0x27d   : > { %v3026_v57 = vpop.eup %3025  ;;  %v2782_v60 = vpack.c.bf16 %v3024_v14, %v3020_v51  ;;  %v1598_v47 = vadd.f32 %v1597_v34, %v3888_v4  ;;  %v1486_v8 = vpop.f32.mrb[30].mxu1  ;;  %3051 = vtanh.f32 %v1596_v20 }
 0x27e   : > { %v3028_v35 = vpop.eup %3027  ;;  %2382 = vst [vmem:[%s3909_s13 + $0x140] sm:$0xff] %v2781_v18  ;;  %v1599_v17 = vpop.f32.mrb[62].mxu0  ;;  %v1487_v32 = vadd.f32 %v1486_v8, %v3877_v38  ;;  %3053 = vtanh.f32 %v1485_v42 }
 0x27f   : > { %v3030_v39 = vpop.eup %3029  ;;  %2383 = vst [vmem:[%s3909_s13 + $0x148] sm:$0xff] %v2782_v60  ;;  %v1488_v46 = vpop.f32.mrb[31].mxu1  ;;  %v1600_v59 = vadd.f32 %v1599_v17, %v3880_v41  ;;  %3055 = vtanh.f32 %v1598_v47 }
 0x280   : > { %v1601_v9 = vpop.f32.mrb[63].mxu0  ;;  %v3032_v28 = vpop.eup %3031  ;;  %v2785_v44 = vpack.c.bf16 %v3030_v39, %v3026_v57  ;;  %v1489_v58 = vadd.f32 %v1488_v46, %v3885_v63  ;;  %3057 = vtanh.f32 %v1487_v32  ;;  %v3995_v63 = vrot.slane %v3871_v31, %v728_v30 }
 0x281   : > { %v3034_v1 = vpop.eup %3033  ;;  %v2786_v6 = vpack.c.bf16 %v3032_v28, %v3028_v35  ;;  %v1602_v38 = vadd.f32 %v1601_v9, %v3888_v4  ;;  %3059 = vtanh.f32 %v1600_v59  ;;  %v1638_v43 = vpop.f32.mrb[32].mxu1 }
 0x282   : > { %v3036_v61 = vpop.eup %3035  ;;  %2386 = vst [vmem:[%s3909_s13 + $0x160] sm:$0xff] %v2785_v44  ;;  %3061 = vtanh.f32 %v1489_v58  ;;  %v1639_v19 = vadd.f32 %v1638_v43, %v3983_v50  ;;  %v1751_v33 = vpop.f32.mrb[64].mxu0 }
 0x283   : > { %v3038_v41 = vpop.eup %3037  ;;  %2387 = vst [vmem:[%s3909_s13 + $0x168] sm:$0xff] %v2786_v6  ;;  %v1640_v55 = vpop.f32.mrb[33].mxu1  ;;  %3063 = vtanh.f32 %v1602_v38  ;;  %v1752_v56 = vadd.f32 %v1751_v33, %v3988_v16 }
 0x284   : > { %v3040_v15 = vpop.eup %3039  ;;  %v2789_v21 = vpack.c.bf16 %v3038_v41, %v3034_v1  ;;  %v1641_v31 = vadd.f32 %v1640_v55, %v3991_v62  ;;  %v1753_v24 = vpop.f32.mrb[65].mxu0  ;;  %3065 = vtanh.f32 %v1639_v19 }
 0x285   : > { %v3042_v3 = vpop.eup %3041  ;;  %v2790_v4 = vpack.c.bf16 %v3040_v15, %v3036_v61  ;;  %v1642_v7 = vpop.f32.mrb[34].mxu1  ;;  %v1754_v54 = vadd.f32 %v1753_v24, %v3995_v63  ;;  %3067 = vtanh.f32 %v1752_v56 }
 0x286   : > { %v3044_v12 = vpop.eup %3043  ;;  %2390 = vst [vmem:[%s3909_s13 + $0x180] sm:$0xff] %v2789_v21  ;;  %v1643_v26 = vadd.f32 %v1642_v7, %v3983_v50  ;;  %v1755_v5 = vpop.f32.mrb[66].mxu0  ;;  %3069 = vtanh.f32 %v1641_v31 }
 0x287   : > { %v3046_v52 = vpop.eup %3045  ;;  %2391 = vst [vmem:[%s3909_s13 + $0x188] sm:$0xff] %v2790_v4  ;;  %v1644_v23 = vpop.f32.mrb[35].mxu1  ;;  %v1756_v49 = vadd.f32 %v1755_v5, %v3988_v16  ;;  %3071 = vtanh.f32 %v1754_v54 }
 0x288   : > { %v3048_v29 = vpop.eup %3047  ;;  %v2793_v48 = vpack.c.bf16 %v3046_v52, %v3042_v3  ;;  %v1757_v10 = vpop.f32.mrb[67].mxu0  ;;  %v1645_v37 = vadd.f32 %v1644_v23, %v3991_v62  ;;  %3073 = vtanh.f32 %v1643_v26 }
 0x289   : > { %v3050_v11 = vpop.eup %3049  ;;  %v2794_v27 = vpack.c.bf16 %v3048_v29, %v3044_v12  ;;  %v1758_v45 = vadd.f32 %v1757_v10, %v3995_v63  ;;  %3075 = vtanh.f32 %v1756_v49  ;;  %v1648_v22 = vpop.f32.mrb[36].mxu1 }
 0x28a   : > { %v3052_v51 = vpop.eup %3051  ;;  %2394 = vst [vmem:[%s3909_s13 + $0x1a0] sm:$0xff] %v2793_v48  ;;  %3077 = vtanh.f32 %v1645_v37  ;;  %v1649_v53 = vadd.f32 %v1648_v22, %v3983_v50  ;;  %v1761_v57 = vpop.f32.mrb[68].mxu0 }
 0x28b   : > { %v3054_v13 = vpop.eup %3053  ;;  %2395 = vst [vmem:[%s3909_s13 + $0x1a8] sm:$0xff] %v2794_v27  ;;  %v1650_v60 = vpop.f32.mrb[37].mxu1  ;;  %3079 = vtanh.f32 %v1758_v45  ;;  %v1762_v20 = vadd.f32 %v1761_v57, %v3988_v16 }
 0x28c   : > { %v3056_v14 = vpop.eup %3055  ;;  %v2797_v18 = vpack.c.bf16 %v3054_v13, %v3050_v11  ;;  %v1651_v25 = vadd.f32 %v1650_v60, %v3991_v62  ;;  %v1763_v34 = vpop.f32.mrb[69].mxu0  ;;  %3081 = vtanh.f32 %v1649_v53 }
 0x28d   : > { %v3058_v0 = vpop.eup %3057  ;;  %v2798_v40 = vpack.c.bf16 %v3056_v14, %v3052_v51  ;;  %v1652_v35 = vpop.f32.mrb[38].mxu1  ;;  %v1764_v47 = vadd.f32 %v1763_v34, %v3995_v63  ;;  %3083 = vtanh.f32 %v1762_v20 }
 0x28e   : > { %v3060_v2 = vpop.eup %3059  ;;  %2398 = vst [vmem:[%s3909_s13 + $0x1c0] sm:$0xff] %v2797_v18  ;;  %v1653_v8 = vadd.f32 %v1652_v35, %v3983_v50  ;;  %v1765_v17 = vpop.f32.mrb[70].mxu0  ;;  %3085 = vtanh.f32 %v1651_v25 }
 0x28f   : > { %v3062_v42 = vpop.eup %3061  ;;  %2399 = vst [vmem:[%s3909_s13 + $0x1c8] sm:$0xff] %v2798_v40  ;;  %v1654_v36 = vpop.f32.mrb[39].mxu1  ;;  %v1766_v46 = vadd.f32 %v1765_v17, %v3988_v16  ;;  %3087 = vtanh.f32 %v1764_v47 }
 0x290   : > { %v3064_v39 = vpop.eup %3063  ;;  %v2801_v32 = vpack.c.bf16 %v3062_v42, %v3058_v0  ;;  %v1767_v9 = vpop.f32.mrb[71].mxu0  ;;  %v1655_v44 = vadd.f32 %v1654_v36, %v3991_v62  ;;  %3089 = vtanh.f32 %v1653_v8 }
 0x291   : > { %v3066_v30 = vpop.eup %3065  ;;  %v2802_v28 = vpack.c.bf16 %v3064_v39, %v3060_v2  ;;  %v1768_v1 = vadd.f32 %v1767_v9, %v3995_v63  ;;  %3091 = vtanh.f32 %v1766_v46  ;;  %v1658_v38 = vpop.f32.mrb[40].mxu1 }
 0x292   : > { %v3068_v59 = vpop.eup %3067  ;;  %2402 = vst [vmem:[%s3909_s13 + $0x1e0] sm:$0xff] %v2801_v32  ;;  %3093 = vtanh.f32 %v1655_v44  ;;  %v1659_v21 = vadd.f32 %v1658_v38, %v3983_v50  ;;  %v1771_v43 = vpop.f32.mrb[72].mxu0 }
 0x293   : > { %v3070_v6 = vpop.eup %3069  ;;  %2403 = vst [vmem:[%s3909_s13 + $0x1e8] sm:$0xff] %v2802_v28  ;;  %v1660_v3 = vpop.f32.mrb[41].mxu1  ;;  %3095 = vtanh.f32 %v1768_v1  ;;  %v1772_v19 = vadd.f32 %v1771_v43, %v3988_v16 }
 0x294   : > { %v3072_v58 = vpop.eup %3071  ;;  %v2743_v61 = vpack.c.bf16 %v3070_v6, %v3066_v30  ;;  %v1661_v33 = vadd.f32 %v1660_v3, %v3991_v62  ;;  %v1773_v55 = vpop.f32.mrb[73].mxu0  ;;  %3097 = vtanh.f32 %v1659_v21 }
 0x295   : > { %v3074_v41 = vpop.eup %3073  ;;  %v2744_v15 = vpack.c.bf16 %v3072_v58, %v3068_v59  ;;  %v1662_v12 = vpop.f32.mrb[42].mxu1  ;;  %v1774_v31 = vadd.f32 %v1773_v55, %v3995_v63  ;;  %3099 = vtanh.f32 %v1772_v19 }
 0x296   : > { %v3076_v4 = vpop.eup %3075  ;;  %2344 = vst [vmem:[%s3909_s13 + $0x10] sm:$0xff] %v2743_v61  ;;  %v1663_v24 = vadd.f32 %v1662_v12, %v3983_v50  ;;  %v1775_v7 = vpop.f32.mrb[74].mxu0  ;;  %3101 = vtanh.f32 %v1661_v33 }
 0x297   : > { %v3078_v56 = vpop.eup %3077  ;;  %2345 = vst [vmem:[%s3909_s13 + $0x18] sm:$0xff] %v2744_v15  ;;  %v1664_v52 = vpop.f32.mrb[43].mxu1  ;;  %v1776_v5 = vadd.f32 %v1775_v7, %v3988_v16  ;;  %3103 = vtanh.f32 %v1774_v31 }
 0x298   : > { %v3080_v54 = vpop.eup %3079  ;;  %v2747_v26 = vpack.c.bf16 %v3078_v56, %v3074_v41  ;;  %v1777_v23 = vpop.f32.mrb[75].mxu0  ;;  %v1665_v49 = vadd.f32 %v1664_v52, %v3991_v62  ;;  %3105 = vtanh.f32 %v1663_v24 }
 0x299   : > { %v3082_v29 = vpop.eup %3081  ;;  %v2748_v48 = vpack.c.bf16 %v3080_v54, %v3076_v4  ;;  %v1778_v11 = vadd.f32 %v1777_v23, %v3995_v63  ;;  %3107 = vtanh.f32 %v1776_v5  ;;  %v1668_v45 = vpop.f32.mrb[44].mxu1 }
 0x29a   : > { %v3084_v10 = vpop.eup %3083  ;;  %2348 = vst [vmem:[%s3909_s13 + $0x30] sm:$0xff] %v2747_v26  ;;  %3109 = vtanh.f32 %v1665_v49  ;;  %v1669_v18 = vadd.f32 %v1668_v45, %v3983_v50  ;;  %v1781_v22 = vpop.f32.mrb[76].mxu0 }
 0x29b   : > { %v3086_v27 = vpop.eup %3085  ;;  %2349 = vst [vmem:[%s3909_s13 + $0x38] sm:$0xff] %v2748_v48  ;;  %v1670_v0 = vpop.f32.mrb[45].mxu1  ;;  %3111 = vtanh.f32 %v1778_v11  ;;  %v1782_v53 = vadd.f32 %v1781_v22, %v3988_v16 }
 0x29c   : > { %v3088_v37 = vpop.eup %3087  ;;  %v2751_v51 = vpack.c.bf16 %v3086_v27, %v3082_v29  ;;  %v1671_v57 = vadd.f32 %v1670_v0, %v3991_v62  ;;  %v1783_v60 = vpop.f32.mrb[77].mxu0  ;;  %3113 = vtanh.f32 %v1669_v18 }
 0x29d   : > { %v3090_v13 = vpop.eup %3089  ;;  %v2752_v14 = vpack.c.bf16 %v3088_v37, %v3084_v10  ;;  %v1672_v2 = vpop.f32.mrb[46].mxu1  ;;  %v1784_v25 = vadd.f32 %v1783_v60, %v3995_v63  ;;  %3115 = vtanh.f32 %v1782_v53 }
 0x29e   : > { %v3092_v40 = vpop.eup %3091  ;;  %2352 = vst [vmem:[%s3909_s13 + $0x50] sm:$0xff] %v2751_v51  ;;  %v1673_v34 = vadd.f32 %v1672_v2, %v3983_v50  ;;  %v1785_v35 = vpop.f32.mrb[78].mxu0  ;;  %3117 = vtanh.f32 %v1671_v57 }
 0x29f   : > { %v3094_v20 = vpop.eup %3093  ;;  %2353 = vst [vmem:[%s3909_s13 + $0x58] sm:$0xff] %v2752_v14  ;;  %v1674_v42 = vpop.f32.mrb[47].mxu1  ;;  %v1786_v17 = vadd.f32 %v1785_v35, %v3988_v16  ;;  %3119 = vtanh.f32 %v1784_v25 }
 0x2a0   : > { %v3096_v47 = vpop.eup %3095  ;;  %v2755_v8 = vpack.c.bf16 %v3094_v20, %v3090_v13  ;;  %v1787_v36 = vpop.f32.mrb[79].mxu0  ;;  %v1675_v46 = vadd.f32 %v1674_v42, %v3991_v62  ;;  %3121 = vtanh.f32 %v1673_v34 }
 0x2a1   : > { %v3098_v39 = vpop.eup %3097  ;;  %v2756_v32 = vpack.c.bf16 %v3096_v47, %v3092_v40  ;;  %v1788_v30 = vadd.f32 %v1787_v36, %v3995_v63  ;;  %3123 = vtanh.f32 %v1786_v17  ;;  %v1678_v1 = vpop.f32.mrb[48].mxu1 }
 0x2a2   : > { %v3100_v9 = vpop.eup %3099  ;;  %2356 = vst [vmem:[%s3909_s13 + $0x70] sm:$0xff] %v2755_v8  ;;  %3125 = vtanh.f32 %v1675_v46  ;;  %v1679_v61 = vadd.f32 %v1678_v1, %v3983_v50  ;;  %v1791_v38 = vpop.f32.mrb[80].mxu0 }
 0x2a3   : > { %v3102_v28 = vpop.eup %3101  ;;  %2357 = vst [vmem:[%s3909_s13 + $0x78] sm:$0xff] %v2756_v32  ;;  %v1680_v41 = vpop.f32.mrb[49].mxu1  ;;  %3127 = vtanh.f32 %v1788_v30  ;;  %v1792_v21 = vadd.f32 %v1791_v38, %v3988_v16 }
 0x2a4   : > { %v3104_v44 = vpop.eup %3103  ;;  %v2759_v59 = vpack.c.bf16 %v3102_v28, %v3098_v39  ;;  %v1681_v43 = vadd.f32 %v1680_v41, %v3991_v62  ;;  %v1793_v3 = vpop.f32.mrb[81].mxu0  ;;  %3129 = vtanh.f32 %v1679_v61 }
 0x2a5   : > { %v3106_v6 = vpop.eup %3105  ;;  %v2760_v58 = vpack.c.bf16 %v3104_v44, %v3100_v9  ;;  %v1682_v4 = vpop.f32.mrb[50].mxu1  ;;  %v1794_v33 = vadd.f32 %v1793_v3, %v3995_v63  ;;  %3131 = vtanh.f32 %v1792_v21 }
 0x2a6   : > { %v3108_v15 = vpop.eup %3107  ;;  %2360 = vst [vmem:[%s3909_s13 + $0x90] sm:$0xff] %v2759_v59  ;;  %v1683_v55 = vadd.f32 %v1682_v4, %v3983_v50  ;;  %v1795_v12 = vpop.f32.mrb[82].mxu0  ;;  %3133 = vtanh.f32 %v1681_v43 }
 0x2a7   : > { %v3110_v19 = vpop.eup %3109  ;;  %2361 = vst [vmem:[%s3909_s13 + $0x98] sm:$0xff] %v2760_v58  ;;  %v1684_v56 = vpop.f32.mrb[51].mxu1  ;;  %v1796_v7 = vadd.f32 %v1795_v12, %v3988_v16  ;;  %3135 = vtanh.f32 %v1794_v33 }
 0x2a8   : > { %v3112_v31 = vpop.eup %3111  ;;  %v2763_v24 = vpack.c.bf16 %v3110_v19, %v3106_v6  ;;  %v1797_v52 = vpop.f32.mrb[83].mxu0  ;;  %v1685_v5 = vadd.f32 %v1684_v56, %v3991_v62  ;;  %3137 = vtanh.f32 %v1683_v55 }
 0x2a9   : > { %v3114_v54 = vpop.eup %3113  ;;  %v2764_v26 = vpack.c.bf16 %v3112_v31, %v3108_v15  ;;  %v1798_v29 = vadd.f32 %v1797_v52, %v3995_v63  ;;  %3139 = vtanh.f32 %v1796_v7  ;;  %v1688_v11 = vpop.f32.mrb[52].mxu1 }
 0x2aa   : > { %v3116_v23 = vpop.eup %3115  ;;  %2364 = vst [vmem:[%s3909_s13 + $0xb0] sm:$0xff] %v2763_v24  ;;  %3141 = vtanh.f32 %v1685_v5  ;;  %v1689_v51 = vadd.f32 %v1688_v11, %v3983_v50  ;;  %v1801_v45 = vpop.f32.mrb[84].mxu0 }
 0x2ab   : > { %v3118_v48 = vpop.eup %3117  ;;  %2365 = vst [vmem:[%s3909_s13 + $0xb8] sm:$0xff] %v2764_v26  ;;  %v1690_v13 = vpop.f32.mrb[53].mxu1  ;;  %3143 = vtanh.f32 %v1798_v29  ;;  %v1802_v18 = vadd.f32 %v1801_v45, %v3988_v16 }
 0x2ac   : > { %v3120_v49 = vpop.eup %3119  ;;  %v2767_v10 = vpack.c.bf16 %v3118_v48, %v3114_v54  ;;  %v1691_v22 = vadd.f32 %v1690_v13, %v3991_v62  ;;  %v1803_v0 = vpop.f32.mrb[85].mxu0  ;;  %3145 = vtanh.f32 %v1689_v51 }
 0x2ad   : > { %v3122_v27 = vpop.eup %3121  ;;  %v2768_v37 = vpack.c.bf16 %v3120_v49, %v3116_v23  ;;  %v1692_v40 = vpop.f32.mrb[54].mxu1  ;;  %v1804_v57 = vadd.f32 %v1803_v0, %v3995_v63  ;;  %3147 = vtanh.f32 %v1802_v18 }
 0x2ae   : > { %v3124_v14 = vpop.eup %3123  ;;  %2368 = vst [vmem:[%s3909_s13 + $0xd0] sm:$0xff] %v2767_v10  ;;  %v1693_v60 = vadd.f32 %v1692_v40, %v3983_v50  ;;  %v1805_v2 = vpop.f32.mrb[86].mxu0  ;;  %3149 = vtanh.f32 %v1691_v22 }
 0x2af   : > { %v3126_v53 = vpop.eup %3125  ;;  %2369 = vst [vmem:[%s3909_s13 + $0xd8] sm:$0xff] %v2768_v37  ;;  %v1694_v20 = vpop.f32.mrb[55].mxu1  ;;  %v1806_v35 = vadd.f32 %v1805_v2, %v3988_v16  ;;  %3151 = vtanh.f32 %v1804_v57 }
 0x2b0   : > { %v3128_v25 = vpop.eup %3127  ;;  %v2771_v34 = vpack.c.bf16 %v3126_v53, %v3122_v27  ;;  %v1807_v42 = vpop.f32.mrb[87].mxu0  ;;  %v1695_v17 = vadd.f32 %v1694_v20, %v3991_v62  ;;  %3153 = vtanh.f32 %v1693_v60 }
 0x2b1   : > { %v3130_v47 = vpop.eup %3129  ;;  %v2772_v8 = vpack.c.bf16 %v3128_v25, %v3124_v14  ;;  %v1808_v39 = vadd.f32 %v1807_v42, %v3995_v63  ;;  %3155 = vtanh.f32 %v1806_v35  ;;  %v1698_v30 = vpop.f32.mrb[56].mxu1 }
 0x2b2   : > { %v3132_v36 = vpop.eup %3131  ;;  %2372 = vst [vmem:[%s3909_s13 + $0xf0] sm:$0xff] %v2771_v34  ;;  %3157 = vtanh.f32 %v1695_v17  ;;  %v1699_v59 = vadd.f32 %v1698_v30, %v3983_v50  ;;  %v1700_v1 = vpop.f32.mrb[57].mxu1 }
 0x2b3   : > { %v3134_v32 = vpop.eup %3133  ;;  %2373 = vst [vmem:[%s3909_s13 + $0xf8] sm:$0xff] %v2772_v8  ;;  %3159 = vtanh.f32 %v1808_v39  ;;  %v1701_v58 = vadd.f32 %v1700_v1, %v3991_v62  ;;  %v1702_v61 = vpop.f32.mrb[58].mxu1 }
 0x2b4   : > { %v3136_v46 = vpop.eup %3135  ;;  %v2775_v9 = vpack.c.bf16 %v3134_v32, %v3130_v47  ;;  %3161 = vtanh.f32 %v1699_v59  ;;  %v1703_v41 = vadd.f32 %v1702_v61, %v3983_v50  ;;  %v1704_v15 = vpop.f32.mrb[59].mxu1 }
 0x2b5   : > { %v3138_v28 = vpop.eup %3137  ;;  %v2776_v44 = vpack.c.bf16 %v3136_v46, %v3132_v36  ;;  %3163 = vtanh.f32 %v1701_v58  ;;  %v1705_v3 = vadd.f32 %v1704_v15, %v3991_v62 }
 0x2b6   : > { %v3140_v6 = vpop.eup %3139  ;;  %2376 = vst [vmem:[%s3909_s13 + $0x110] sm:$0xff] %v2775_v9  ;;  %3165 = vtanh.f32 %v1703_v41 }
 0x2b7   : > { %v3142_v38 = vpop.eup %3141  ;;  %2377 = vst [vmem:[%s3909_s13 + $0x118] sm:$0xff] %v2776_v44  ;;  %3167 = vtanh.f32 %v1705_v3 }
 0x2b8   : > { %v3144_v21 = vpop.eup %3143  ;;  %v2779_v43 = vpack.c.bf16 %v3142_v38, %v3138_v28 }
 0x2b9   : > { %v3146_v4 = vpop.eup %3145  ;;  %v2780_v19 = vpack.c.bf16 %v3144_v21, %v3140_v6  ;;  %v1708_v31 = vpop.f32.mrb[60].mxu1 }
 0x2ba   : > { %v3148_v33 = vpop.eup %3147  ;;  %2380 = vst [vmem:[%s3909_s13 + $0x130] sm:$0xff] %v2779_v43  ;;  %v1709_v52 = vadd.f32 %v1708_v31, %v3983_v50  ;;  %v1710_v54 = vpop.f32.mrb[61].mxu1 }
 0x2bb   : > { %v3150_v55 = vpop.eup %3149  ;;  %2381 = vst [vmem:[%s3909_s13 + $0x138] sm:$0xff] %v2780_v19  ;;  %v1711_v5 = vadd.f32 %v1710_v54, %v3991_v62  ;;  %v1712_v23 = vpop.f32.mrb[62].mxu1 }
 0x2bc   : > { %v3152_v12 = vpop.eup %3151  ;;  %v2783_v56 = vpack.c.bf16 %v3150_v55, %v3146_v4  ;;  %3169 = vtanh.f32 %v1709_v52  ;;  %v1713_v48 = vadd.f32 %v1712_v23, %v3983_v50  ;;  %v1714_v49 = vpop.f32.mrb[63].mxu1 }
 0x2bd   : > { %v3154_v24 = vpop.eup %3153  ;;  %v2784_v7 = vpack.c.bf16 %v3152_v12, %v3148_v33  ;;  %3171 = vtanh.f32 %v1711_v5  ;;  %v1715_v27 = vadd.f32 %v1714_v49, %v3991_v62 }
 0x2be   : > { %v3156_v26 = vpop.eup %3155  ;;  %2384 = vst [vmem:[%s3909_s13 + $0x150] sm:$0xff] %v2783_v56  ;;  %3173 = vtanh.f32 %v1713_v48 }
 0x2bf   : > { %v3158_v29 = vpop.eup %3157  ;;  %2385 = vst [vmem:[%s3909_s13 + $0x158] sm:$0xff] %v2784_v7  ;;  %3175 = vtanh.f32 %v1715_v27 }
 0x2c0   : > { %v3160_v10 = vpop.eup %3159  ;;  %v2787_v11 = vpack.c.bf16 %v3158_v29, %v3154_v24 }
 0x2c1   : > { %v3162_v37 = vpop.eup %3161  ;;  %v2788_v51 = vpack.c.bf16 %v3160_v10, %v3156_v26  ;;  %v1811_v22 = vpop.f32.mrb[64].mxu1 }
 0x2c2   : > { %v3164_v45 = vpop.eup %3163  ;;  %2388 = vst [vmem:[%s3909_s13 + $0x170] sm:$0xff] %v2787_v11  ;;  %v1812_v0 = vadd.f32 %v1811_v22, %v3988_v16  ;;  %v1813_v40 = vpop.f32.mrb[65].mxu1 }
 0x2c3   : > { %v3166_v13 = vpop.eup %3165  ;;  %2389 = vst [vmem:[%s3909_s13 + $0x178] sm:$0xff] %v2788_v51  ;;  %v2791_v14 = vpack.c.bf16 %v3164_v45, %v3162_v37  ;;  %v1814_v53 = vadd.f32 %v1813_v40, %v3995_v63  ;;  %v1815_v62 = vpop.f32.mrb[66].mxu1 }
 0x2c4   : > { %v3168_v18 = vpop.eup %3167  ;;  %3177 = vtanh.f32 %v1812_v0  ;;  %v1816_v57 = vadd.f32 %v1815_v62, %v3988_v16  ;;  %v1817_v60 = vpop.f32.mrb[67].mxu1 }
 0x2c5   : > { %2392 = vst [vmem:[%s3909_s13 + $0x190] sm:$0xff] %v2791_v14  ;;  %v2795_v50 = vpack.c.bf16 %v3168_v18, %v3166_v13  ;;  %3179 = vtanh.f32 %v1814_v53  ;;  %v1818_v2 = vadd.f32 %v1817_v60, %v3995_v63 }
 0x2c6   : > { %v3170_v20 = vpop.eup %3169  ;;  %3181 = vtanh.f32 %v1816_v57 }
 0x2c7   : > { %2396 = vst [vmem:[%s3909_s13 + $0x1b0] sm:$0xff] %v2795_v50  ;;  %v3172_v25 = vpop.eup %3171  ;;  %3183 = vtanh.f32 %v1818_v2 }
 0x2c8   : > { %v3174_v34 = vpop.eup %3173  ;;  %v2799_v35 = vpack.c.bf16 %v3172_v25, %v3170_v20 }
 0x2c9   : > { %v3176_v42 = vpop.eup %3175  ;;  %v1821_v47 = vpop.f32.mrb[68].mxu1 }
 0x2ca   : > { %2400 = vst [vmem:[%s3909_s13 + $0x1d0] sm:$0xff] %v2799_v35  ;;  %v2803_v8 = vpack.c.bf16 %v3176_v42, %v3174_v34  ;;  %v1822_v17 = vadd.f32 %v1821_v47, %v3988_v16  ;;  %v1823_v36 = vpop.f32.mrb[69].mxu1 }
 0x2cb   : > { %v1824_v39 = vadd.f32 %v1823_v36, %v3995_v63  ;;  %v1825_v32 = vpop.f32.mrb[70].mxu1 }
 0x2cc   : > { %2404 = vst [vmem:[%s3909_s13 + $0x1f0] sm:$0xff] %v2803_v8  ;;  %3185 = vtanh.f32 %v1822_v17  ;;  %v1826_v46 = vadd.f32 %v1825_v32, %v3988_v16  ;;  %v1827_v9 = vpop.f32.mrb[71].mxu1 }
 0x2cd   : > { %3187 = vtanh.f32 %v1824_v39  ;;  %v1828_v30 = vadd.f32 %v1827_v9, %v3995_v63 }
 0x2ce   : > { %v3178_v28 = vpop.eup %3177  ;;  %3189 = vtanh.f32 %v1826_v46 }
 0x2cf   : > { %v3180_v44 = vpop.eup %3179  ;;  %3191 = vtanh.f32 %v1828_v30 }
 0x2d0   : > { %v3182_v59 = vpop.eup %3181  ;;  %v2792_v1 = vpack.c.bf16 %v3180_v44, %v3178_v28 }
 0x2d1   : > { %v3184_v6 = vpop.eup %3183 }
 0x2d2   : > { %2393 = vst [vmem:[%s3909_s13 + $0x198] sm:$0xff] %v2792_v1  ;;  %v2796_v58 = vpack.c.bf16 %v3184_v6, %v3182_v59 }
 0x2d4   : > { %2397 = vst [vmem:[%s3909_s13 + $0x1b8] sm:$0xff] %v2796_v58 }
 0x2d6   : > { %v3186_v16 = vpop.eup %3185 }
 0x2d7   : > { %v3188_v61 = vpop.eup %3187 }
 0x2d8   : > { %v3190_v38 = vpop.eup %3189  ;;  %v2800_v63 = vpack.c.bf16 %v3188_v61, %v3186_v16 }
 0x2d9   : > { %v3192_v41 = vpop.eup %3191 }
 0x2da   : > { %2401 = vst [vmem:[%s3909_s13 + $0x1d8] sm:$0xff] %v2800_v63  ;;  %v2804_v15 = vpack.c.bf16 %v3192_v41, %v3190_v38 }
 0x2dc   : > { %2405 = vst [vmem:[%s3909_s13 + $0x1f8] sm:$0xff] %v2804_v15 }
 0x2dd   : > { %3292 = shalt.err (!%p3289_p7)
}
 0x2de   : > { %s3293_s24 = scalar_lea.hbm %s4104_s30, 8192  ;;  %s3297_s16 = scalar_lea.hbm %s4156_s5, 32768 }
 0x2df   : > { %p3294_p9 = scmp.ne.s32.totalorder %s4104_s30, %s3293_s24  ;;  %p3298_p5 = scmp.lt.u32.totalorder %s4104_s30, %s4156_s5 }
 0x2e0   : > { %p3299_p10 = scmp.lt.u32.totalorder %s3297_s16, %s3293_s24  ;;  %p3301_p2 = scmp.lt.u32.totalorder %s3293_s24, %s4104_s30 }
 0x2e1   : > { %p3295_p12 = pnand %p3294_p9, %p3510_p8 }
 0x2e2   : > { %p3300_p1 = por %p3299_p10, %p3298_p5 }
 0x2e3   : > { %p3296_p0 = pneg %p3295_p12 }
 0x2e4   : > { %p3302_p4 = por %p3301_p2, %p3300_p1 }
 0x2e6   : > { %p3303_p6 = pnand %p3302_p4, %p3296_p0 }
 0x2e8   : > { %3306 = shalt.err (!%p3303_p6)
}
 0x2e9   : > { %s3360_s14 = smov 512   ;;  %s3361_s29 = smov 32  }
 0x2ea   : > { %2849 = dma.vmem_to_hbm [thread:$0]  (%p3510_p8), %s4106_s17, 8192, %s4104_s30, %s2407_s9, %s3360_s14, %s3360_s14, %s3361_s29  }
 0x2eb PF: > { %p2871_p11 = scmp.ge.s32.totalorder %s3349_s21, 2  ;;  %s2436_s12 = sand.u32 1, %s3337_s18  }
 0x2ec   : > { %p4192_p13 = scmp.ne.s32.totalorder %s4170_s25, 0  ;;  %s2437_s22 = scalar_lea.sflag [#allocation4], %s2436_s12 }
 0x2ee   : > { %p2863_p3 = pnand %p2871_p11, %p4192_p13 }
 0x2f0   : > { %3332 = dma.done.wait (!%p2863_p3), %s2437_s22, 8192  }
 0x2f1   : > { %3334 = vsyncadd (!%p2863_p3), %s2437_s22, 4294959104  ;;  %p19_p7 = scmp.ge.s32.totalorder %s3497_s23, 6   ;;  %s4193_s18 = smov %s3341_s19 }
 0x2f2   : > { %s4194_s19 = smov %s3345_s20  ;;  %s4195_s20 = smov %s3506_s7 }
 0x2f3   : > { %s4196_s21 = smov %s3497_s23  ;;  %21 = sbr.rel (!%p19_p7) target bundleno = 6 (0x6), region = 93 }
 0x2fa   :  { %2442 = vsyncpa [#allocation3], 1 }
 0x2fb   :  { %2444 = vsyncpa [#allocation3 + $0x1], 1 }
 0x2fc   :  { %2445 = vsyncpa [#allocation6], 1 }
 0x2fd   :  { %2446 = vsyncpa [#allocation4], 1 }
 0x2fe   :  { %2448 = vsyncpa [#allocation4 + $0x1], 1 }

</bundles_post_ra>
